<compile_context>
chip_gen: v7x
topology: tpu7x:2x2x1
jax: 0.10.0
libtpu: 0.0.40
codegen_flags: <defaults>
</compile_context>

<pallas_src>
import functools

import jax
import jax.numpy as jnp
from jax.experimental import pallas as pl
from jax.experimental.pallas import tpu as pltpu

_HIDDEN = 512
_LANE = 128


def _round_up(x, m):
    return ((x + m - 1) // m) * m


# --------------------------------------------------------------------------
# Kernel: whole network (both branches) in one step.
# --------------------------------------------------------------------------
def _fused_net_kernel(x_ref, w1_ref, b1_ref, wmid_ref, bmid_ref,
                      w4_ref, b4_ref, o_pi_ref, o_vf_ref):
    """Fused forward of policy + value MLPs (4x Linear+Tanh each).

    Ref shapes (full arrays, VMEM resident):
      x_ref    : [B, F]               f32
      w1_ref   : [F, 1024]            bf16  (policy cols 0:512, value 512:1024)
      b1_ref   : [1, 1024]            f32
      wmid_ref : [2, 2, 512, 512]     bf16  ([branch, layer])
      bmid_ref : [2, 2, 512]          f32
      w4_ref   : [2, 512, DPAD]       bf16  (DPAD = 128-multiple, zero padded)
      b4_ref   : [2, DPAD]            f32
      o_pi_ref : [B, DPAD]            f32
      o_vf_ref : [B, DPAD]            f32
    """
    x = x_ref[...].astype(jnp.bfloat16)

    # Layer 1 for BOTH branches as one [F, 1024] matmul (single MXU RHS push).
    h = jnp.dot(x, w1_ref[...], preferred_element_type=jnp.float32)
    h = jnp.tanh(h + b1_ref[...])

    def tail(h_b, br, o_ref):
        # Layers 2 & 3 (512 x 512), then the lane-padded output layer.
        for layer in range(2):
            h_b = jnp.dot(h_b.astype(jnp.bfloat16), wmid_ref[br, layer],
                          preferred_element_type=jnp.float32)
            h_b = jnp.tanh(h_b + bmid_ref[br, layer:layer + 1, :])
        out = jnp.dot(h_b.astype(jnp.bfloat16), w4_ref[br],
                      preferred_element_type=jnp.float32)
        o_ref[...] = jnp.tanh(out + b4_ref[br:br + 1, :]).astype(o_ref.dtype)

    tail(h[:, :_HIDDEN], 0, o_pi_ref)   # policy branch
    tail(h[:, _HIDDEN:], 1, o_vf_ref)   # value branch


def _fused_forward(features, packed):
    w1, b1, wmid, bmid, w4, b4 = packed
    batch = features.shape[0]
    d_pad = w4.shape[-1]
    vmem_spec = pl.BlockSpec(memory_space=pltpu.MemorySpace.VMEM)
    return pl.pallas_call(
        _fused_net_kernel,
        out_shape=(jax.ShapeDtypeStruct((batch, d_pad), jnp.float32),
                   jax.ShapeDtypeStruct((batch, d_pad), jnp.float32)),
        in_specs=[vmem_spec] * 7,
        out_specs=(vmem_spec, vmem_spec),
    )(features, w1, b1, wmid, bmid, w4, b4)


@functools.partial(jax.jit, static_argnums=(2, 3))
def custom_network_forward(features, packed_params, d_pi, d_vf):
    """Equivalent of CustomNetwork.forward -> (latent_policy, latent_value)."""
    out_pi, out_vf = _fused_forward(features, packed_params)
    return out_pi[:, :d_pi], out_vf[:, :d_vf]


# --------------------------------------------------------------------------
# Parameter construction (PyTorch-like init), packed for the fused kernel.
# --------------------------------------------------------------------------
def _init_linear(key, in_dim, out_dim):
    """Deterministic PyTorch-like init: U(-1/sqrt(in), 1/sqrt(in))."""
    kw, kb = jax.random.split(key)
    bound = 1.0 / jnp.sqrt(jnp.float32(in_dim))
    # Weight stored as [in, out] (PyTorch stores [out, in] and does x @ W.T).
    w = jax.random.uniform(kw, (in_dim, out_dim), jnp.float32, -bound, bound)
    b = jax.random.uniform(kb, (out_dim,), jnp.float32, -bound, bound)
    return w, b


def make_custom_network_params(key, feature_dim,
                               last_layer_dim_pi=64, last_layer_dim_vf=64):
    """Returns (packed_params for the kernel, raw f32 per-branch layers)."""
    d_pad = max(_LANE,
                _round_up(max(last_layer_dim_pi, last_layer_dim_vf), _LANE))
    keys = jax.random.split(key, 8)

    def build_branch(branch_keys, d_out):
        dims = [feature_dim, _HIDDEN, _HIDDEN, _HIDDEN, d_out]
        return [_init_linear(branch_keys[i], dims[i], dims[i + 1])
                for i in range(4)]

    pi_layers = build_branch(keys[:4], last_layer_dim_pi)
    vf_layers = build_branch(keys[4:], last_layer_dim_vf)

    def pad_out(w, b):
        pad = d_pad - w.shape[1]
        return jnp.pad(w, ((0, 0), (0, pad))), jnp.pad(b, ((0, pad),))

    w4_pi, b4_pi = pad_out(*pi_layers[3])
    w4_vf, b4_vf = pad_out(*vf_layers[3])

    w1 = jnp.concatenate([pi_layers[0][0], vf_layers[0][0]],
                         axis=1).astype(jnp.bfloat16)            # [F, 1024]
    b1 = jnp.concatenate([pi_layers[0][1], vf_layers[0][1]])[None, :]  # [1,1024]
    wmid = jnp.stack([
        jnp.stack([pi_layers[1][0], pi_layers[2][0]]),
        jnp.stack([vf_layers[1][0], vf_layers[2][0]]),
    ]).astype(jnp.bfloat16)                                       # [2,2,512,512]
    bmid = jnp.stack([
        jnp.stack([pi_layers[1][1], pi_layers[2][1]]),
        jnp.stack([vf_layers[1][1], vf_layers[2][1]]),
    ])                                                            # [2,2,512] f32
    w4 = jnp.stack([w4_pi, w4_vf]).astype(jnp.bfloat16)           # [2,512,DPAD]
    b4 = jnp.stack([b4_pi, b4_vf])                                # [2,DPAD] f32

    packed = (w1, b1, wmid, bmid, w4, b4)
    raw_f32 = {"pi": pi_layers, "vf": vf_layers}
    return packed, raw_f32


# --------------------------------------------------------------------------
# References.
# --------------------------------------------------------------------------
def _reference_forward_f32(features, raw_f32):
    """True f32 reference == the original PyTorch CustomNetwork math."""
    def branch(layers):
        h = features
        for w, b in layers:
            h = jnp.tanh(h @ w + b)
        return h
    return branch(raw_f32["pi"]), branch(raw_f32["vf"])


def _reference_forward_bf16(features, packed, d_pi, d_vf):
    """Pure-JAX reference with the same bf16-weight / f32-accumulate math."""
    w1, b1, wmid, bmid, w4, b4 = packed
    x = features.astype(jnp.bfloat16)
    h = jnp.tanh(jnp.dot(x, w1, preferred_element_type=jnp.float32) + b1)

    def tail(h_b, br):
        for layer in range(2):
            h_b = jnp.dot(h_b.astype(jnp.bfloat16), wmid[br, layer],
                          preferred_element_type=jnp.float32)
            h_b = jnp.tanh(h_b + bmid[br, layer])
        out = jnp.dot(h_b.astype(jnp.bfloat16), w4[br],
                      preferred_element_type=jnp.float32)
        return jnp.tanh(out + b4[br])

    return tail(h[:, :_HIDDEN], 0)[:, :d_pi], tail(h[:, _HIDDEN:], 1)[:, :d_vf]


if __name__ == "__main__":
    key = jax.random.PRNGKey(0)
    k_x, k_params = jax.random.split(key)

    batch = 2
    feature_dim = 32
    last_layer_dim_pi = 64
    last_layer_dim_vf = 64

    features = jax.random.normal(k_x, (batch, feature_dim), jnp.float32)
    packed_params, raw_f32 = make_custom_network_params(
        k_params, feature_dim, last_layer_dim_pi, last_layer_dim_vf)

    latent_pi, latent_vf = custom_network_forward(
        features, packed_params, last_layer_dim_pi, last_layer_dim_vf)
    jax.block_until_ready((latent_pi, latent_vf))

    assert latent_pi.shape == (batch, last_layer_dim_pi)
    assert latent_vf.shape == (batch, last_layer_dim_vf)

    # Tight check vs. a JAX reference using the same bf16 weights / f32 acc.
    ref_pi_bf16, ref_vf_bf16 = _reference_forward_bf16(
        features, packed_params, last_layer_dim_pi, last_layer_dim_vf)
    assert jnp.allclose(latent_pi, ref_pi_bf16, atol=2e-3, rtol=2e-3)
    assert jnp.allclose(latent_vf, ref_vf_bf16, atol=2e-3, rtol=2e-3)

    # Loose check vs. the true f32 reference (original PyTorch semantics),
    # bounding the bf16 weight-quantization error through the 4 tanh layers.
    ref_pi_f32, ref_vf_f32 = _reference_forward_f32(features, raw_f32)
    assert jnp.allclose(latent_pi, ref_pi_f32, atol=3e-2, rtol=0)
    assert jnp.allclose(latent_vf, ref_vf_f32, atol=3e-2, rtol=0)

    print("KERNEL_OK")
</pallas_src>

<mosaic_0001>
module attributes {stable_mosaic.version = 11 : i64} {
  func.func @_fused_net_kernel(%arg0: memref<2x32xf32, #tpu.memory_space<vmem>>, %arg1: memref<32x1024xbf16, #tpu.memory_space<vmem>>, %arg2: memref<1x1024xf32, #tpu.memory_space<vmem>>, %arg3: memref<2x2x512x512xbf16, #tpu.memory_space<vmem>>, %arg4: memref<2x2x512xf32, #tpu.memory_space<vmem>>, %arg5: memref<2x512x128xbf16, #tpu.memory_space<vmem>>, %arg6: memref<2x128xf32, #tpu.memory_space<vmem>>, %arg7: memref<2x128xf32, #tpu.memory_space<vmem>>, %arg8: memref<2x128xf32, #tpu.memory_space<vmem>>) attributes {dimension_semantics = [], scalar_prefetch = 0 : i64, scratch_operands = 0 : i64, tpu.core_type = #tpu.core_type<tc>} {
    %c0 = arith.constant 0 : index
    %c0_0 = arith.constant 0 : index
    %0 = vector.load %arg0[%c0, %c0_0] : memref<2x32xf32, #tpu.memory_space<vmem>>, vector<2x32xf32>
    %1 = arith.truncf %0 : vector<2x32xf32> to vector<2x32xbf16>
    %c0_1 = arith.constant 0 : index
    %c0_2 = arith.constant 0 : index
    %2 = vector.load %arg1[%c0_1, %c0_2] : memref<32x1024xbf16, #tpu.memory_space<vmem>>, vector<32x1024xbf16>
    %cst = arith.constant dense<0.000000e+00> : vector<2x1024xf32>
    %3 = tpu.matmul %1, %2, %cst {dimension_numbers = #tpu.dot_dimension_numbers<[1], [0], [0], [1], [0, 0, 1, 1], [], []>} : vector<2x32xbf16>, vector<32x1024xbf16>, vector<2x1024xf32> -> vector<2x1024xf32>
    %c0_3 = arith.constant 0 : index
    %c0_4 = arith.constant 0 : index
    %4 = vector.load %arg2[%c0_3, %c0_4] : memref<1x1024xf32, #tpu.memory_space<vmem>>, vector<1x1024xf32>
    %5 = vector.broadcast %4 : vector<1x1024xf32> to vector<2x1024xf32>
    %6 = arith.addf %3, %5 : vector<2x1024xf32>
    %7 = math.tanh %6 : vector<2x1024xf32>
    %8 = vector.extract_strided_slice %7 {offsets = [0, 0], sizes = [2, 512], strides = [1, 1]} : vector<2x1024xf32> to vector<2x512xf32>
    %9 = arith.truncf %8 : vector<2x512xf32> to vector<2x512xbf16>
    %c0_5 = arith.constant 0 : index
    %c0_6 = arith.constant 0 : index
    %c0_7 = arith.constant 0 : index
    %c0_8 = arith.constant 0 : index
    %10 = vector.load %arg3[%c0_5, %c0_6, %c0_7, %c0_8] : memref<2x2x512x512xbf16, #tpu.memory_space<vmem>>, vector<1x1x512x512xbf16>
    %11 = vector.shape_cast %10 : vector<1x1x512x512xbf16> to vector<512x512xbf16>
    %cst_9 = arith.constant dense<0.000000e+00> : vector<2x512xf32>
    %12 = tpu.matmul %9, %11, %cst_9 {dimension_numbers = #tpu.dot_dimension_numbers<[1], [0], [0], [1], [0, 0, 1, 1], [], []>} : vector<2x512xbf16>, vector<512x512xbf16>, vector<2x512xf32> -> vector<2x512xf32>
    %c0_10 = arith.constant 0 : index
    %c0_11 = arith.constant 0 : index
    %c0_12 = arith.constant 0 : index
    %13 = vector.load %arg4[%c0_10, %c0_11, %c0_12] : memref<2x2x512xf32, #tpu.memory_space<vmem>>, vector<1x1x512xf32>
    %14 = vector.shape_cast %13 : vector<1x1x512xf32> to vector<1x512xf32>
    %15 = vector.broadcast %14 : vector<1x512xf32> to vector<2x512xf32>
    %16 = arith.addf %12, %15 : vector<2x512xf32>
    %17 = math.tanh %16 : vector<2x512xf32>
    %18 = arith.truncf %17 : vector<2x512xf32> to vector<2x512xbf16>
    %c0_13 = arith.constant 0 : index
    %c1 = arith.constant 1 : index
    %c0_14 = arith.constant 0 : index
    %c0_15 = arith.constant 0 : index
    %19 = vector.load %arg3[%c0_13, %c1, %c0_14, %c0_15] : memref<2x2x512x512xbf16, #tpu.memory_space<vmem>>, vector<1x1x512x512xbf16>
    %20 = vector.shape_cast %19 : vector<1x1x512x512xbf16> to vector<512x512xbf16>
    %cst_16 = arith.constant dense<0.000000e+00> : vector<2x512xf32>
    %21 = tpu.matmul %18, %20, %cst_16 {dimension_numbers = #tpu.dot_dimension_numbers<[1], [0], [0], [1], [0, 0, 1, 1], [], []>} : vector<2x512xbf16>, vector<512x512xbf16>, vector<2x512xf32> -> vector<2x512xf32>
    %c0_17 = arith.constant 0 : index
    %c1_18 = arith.constant 1 : index
    %c0_19 = arith.constant 0 : index
    %22 = vector.load %arg4[%c0_17, %c1_18, %c0_19] : memref<2x2x512xf32, #tpu.memory_space<vmem>>, vector<1x1x512xf32>
    %23 = vector.shape_cast %22 : vector<1x1x512xf32> to vector<1x512xf32>
    %24 = vector.broadcast %23 : vector<1x512xf32> to vector<2x512xf32>
    %25 = arith.addf %21, %24 : vector<2x512xf32>
    %26 = math.tanh %25 : vector<2x512xf32>
    %27 = arith.truncf %26 : vector<2x512xf32> to vector<2x512xbf16>
    %c0_20 = arith.constant 0 : index
    %c0_21 = arith.constant 0 : index
    %c0_22 = arith.constant 0 : index
    %28 = vector.load %arg5[%c0_20, %c0_21, %c0_22] : memref<2x512x128xbf16, #tpu.memory_space<vmem>>, vector<1x512x128xbf16>
    %29 = vector.shape_cast %28 : vector<1x512x128xbf16> to vector<512x128xbf16>
    %cst_23 = arith.constant dense<0.000000e+00> : vector<2x128xf32>
    %30 = tpu.matmul %27, %29, %cst_23 {dimension_numbers = #tpu.dot_dimension_numbers<[1], [0], [0], [1], [0, 0, 1, 1], [], []>} : vector<2x512xbf16>, vector<512x128xbf16>, vector<2x128xf32> -> vector<2x128xf32>
    %c0_24 = arith.constant 0 : index
    %c0_25 = arith.constant 0 : index
    %31 = vector.load %arg6[%c0_24, %c0_25] : memref<2x128xf32, #tpu.memory_space<vmem>>, vector<1x128xf32>
    %32 = vector.broadcast %31 : vector<1x128xf32> to vector<2x128xf32>
    %33 = arith.addf %30, %32 : vector<2x128xf32>
    %34 = math.tanh %33 : vector<2x128xf32>
    %c0_26 = arith.constant 0 : index
    %c0_27 = arith.constant 0 : index
    %35 = vector.load %arg7[%c0_26, %c0_27] : memref<2x128xf32, #tpu.memory_space<vmem>>, vector<2x128xf32>
    tpu.vector_store %arg7[%c0_26, %c0_27], %34 {strides = array<i32>} : memref<2x128xf32, #tpu.memory_space<vmem>>, vector<2x128xf32>,
    %36 = vector.extract_strided_slice %7 {offsets = [0, 512], sizes = [2, 512], strides = [1, 1]} : vector<2x1024xf32> to vector<2x512xf32>
    %37 = arith.truncf %36 : vector<2x512xf32> to vector<2x512xbf16>
    %c1_28 = arith.constant 1 : index
    %c0_29 = arith.constant 0 : index
    %c0_30 = arith.constant 0 : index
    %c0_31 = arith.constant 0 : index
    %38 = vector.load %arg3[%c1_28, %c0_29, %c0_30, %c0_31] : memref<2x2x512x512xbf16, #tpu.memory_space<vmem>>, vector<1x1x512x512xbf16>
    %39 = vector.shape_cast %38 : vector<1x1x512x512xbf16> to vector<512x512xbf16>
    %cst_32 = arith.constant dense<0.000000e+00> : vector<2x512xf32>
    %40 = tpu.matmul %37, %39, %cst_32 {dimension_numbers = #tpu.dot_dimension_numbers<[1], [0], [0], [1], [0, 0, 1, 1], [], []>} : vector<2x512xbf16>, vector<512x512xbf16>, vector<2x512xf32> -> vector<2x512xf32>
    %c1_33 = arith.constant 1 : index
    %c0_34 = arith.constant 0 : index
    %c0_35 = arith.constant 0 : index
    %41 = vector.load %arg4[%c1_33, %c0_34, %c0_35] : memref<2x2x512xf32, #tpu.memory_space<vmem>>, vector<1x1x512xf32>
    %42 = vector.shape_cast %41 : vector<1x1x512xf32> to vector<1x512xf32>
    %43 = vector.broadcast %42 : vector<1x512xf32> to vector<2x512xf32>
    %44 = arith.addf %40, %43 : vector<2x512xf32>
    %45 = math.tanh %44 : vector<2x512xf32>
    %46 = arith.truncf %45 : vector<2x512xf32> to vector<2x512xbf16>
    %c1_36 = arith.constant 1 : index
    %c1_37 = arith.constant 1 : index
    %c0_38 = arith.constant 0 : index
    %c0_39 = arith.constant 0 : index
    %47 = vector.load %arg3[%c1_36, %c1_37, %c0_38, %c0_39] : memref<2x2x512x512xbf16, #tpu.memory_space<vmem>>, vector<1x1x512x512xbf16>
    %48 = vector.shape_cast %47 : vector<1x1x512x512xbf16> to vector<512x512xbf16>
    %cst_40 = arith.constant dense<0.000000e+00> : vector<2x512xf32>
    %49 = tpu.matmul %46, %48, %cst_40 {dimension_numbers = #tpu.dot_dimension_numbers<[1], [0], [0], [1], [0, 0, 1, 1], [], []>} : vector<2x512xbf16>, vector<512x512xbf16>, vector<2x512xf32> -> vector<2x512xf32>
    %c1_41 = arith.constant 1 : index
    %c1_42 = arith.constant 1 : index
    %c0_43 = arith.constant 0 : index
    %50 = vector.load %arg4[%c1_41, %c1_42, %c0_43] : memref<2x2x512xf32, #tpu.memory_space<vmem>>, vector<1x1x512xf32>
    %51 = vector.shape_cast %50 : vector<1x1x512xf32> to vector<1x512xf32>
    %52 = vector.broadcast %51 : vector<1x512xf32> to vector<2x512xf32>
    %53 = arith.addf %49, %52 : vector<2x512xf32>
    %54 = math.tanh %53 : vector<2x512xf32>
    %55 = arith.truncf %54 : vector<2x512xf32> to vector<2x512xbf16>
    %c1_44 = arith.constant 1 : index
    %c0_45 = arith.constant 0 : index
    %c0_46 = arith.constant 0 : index
    %56 = vector.load %arg5[%c1_44, %c0_45, %c0_46] : memref<2x512x128xbf16, #tpu.memory_space<vmem>>, vector<1x512x128xbf16>
    %57 = vector.shape_cast %56 : vector<1x512x128xbf16> to vector<512x128xbf16>
    %cst_47 = arith.constant dense<0.000000e+00> : vector<2x128xf32>
    %58 = tpu.matmul %55, %57, %cst_47 {dimension_numbers = #tpu.dot_dimension_numbers<[1], [0], [0], [1], [0, 0, 1, 1], [], []>} : vector<2x512xbf16>, vector<512x128xbf16>, vector<2x128xf32> -> vector<2x128xf32>
    %c1_48 = arith.constant 1 : index
    %c0_49 = arith.constant 0 : index
    %59 = vector.load %arg6[%c1_48, %c0_49] : memref<2x128xf32, #tpu.memory_space<vmem>>, vector<1x128xf32>
    %60 = vector.broadcast %59 : vector<1x128xf32> to vector<2x128xf32>
    %61 = arith.addf %58, %60 : vector<2x128xf32>
    %62 = math.tanh %61 : vector<2x128xf32>
    %c0_50 = arith.constant 0 : index
    %c0_51 = arith.constant 0 : index
    %63 = vector.load %arg8[%c0_50, %c0_51] : memref<2x128xf32, #tpu.memory_space<vmem>>, vector<2x128xf32>
    tpu.vector_store %arg8[%c0_50, %c0_51], %62 {strides = array<i32>} : memref<2x128xf32, #tpu.memory_space<vmem>>, vector<2x128xf32>,
    return
  }
}

</mosaic_0001>

<bundles_post_ra>
// kernel: custom_network_forward.1
= control target key start
LH: loop header
LB: loop body
LE: loop exit
PB: predicated region body
PF: predicated region fallthrough
CT: control target
= control target key end

     0   :  { %14 = vsyncpa [#allocation3], 0  ;;  %s7123_s0 = inlined_call_operand.hbm [shape: f32[2,32], index: 0, kind: input, shape index: {}]   ;;  %s7124_s1 = inlined_call_operand.hbm [shape: bf16[32,1024], index: 1, kind: input, shape index: {}]   ;;  %s7125_s2 = inlined_call_operand.hbm [shape: f32[1,1024], index: 2, kind: input, shape index: {}]   ;;  %s7126_s3 = inlined_call_operand.hbm [shape: bf16[2,2,512,512], index: 3, kind: input, shape index: {}]   ;;  %s7127_s4 = inlined_call_operand.hbm [shape: f32[2,2,512], index: 4, kind: input, shape index: {}]   ;;  %s7128_s5 = inlined_call_operand.hbm [shape: bf16[2,512,128], index: 5, kind: input, shape index: {}]   ;;  %s7129_s6 = inlined_call_operand.hbm [shape: f32[2,128], index: 6, kind: input, shape index: {}]   ;;  %s7130_s7 = inlined_call_operand.hbm [shape: f32[2,128], index: 7, kind: output, shape index: {0}]   ;;  %s7131_s8 = inlined_call_operand.hbm [shape: f32[2,128], index: 8, kind: output, shape index: {1}]  }
   0x1   :  { %15 = vsyncpa [#allocation6], 0 }
   0x2   :  { %16 = vsyncpa [#allocation9], 0 }
   0x3   :  { %17 = vsyncpa [#allocation12], 0 }
   0x4   :  { %18 = vsyncpa [#allocation4], 0 }
   0x5   :  { %19 = vsyncpa [#allocation16], 0  ;;  %s6865_s27 = smov [#allocation5]   ;;  %s6655_s9 = scalar_lea.hbm %s7124_s1, 2048 }
   0x6   :  { %s35_s28 = sshll.u32 %s6865_s27, 4  ;;  %p6656_p0 = scmp.ne.s32.totalorder %s7124_s1, %s6655_s9  ;;  %s36_s28 = int_to_ptr.vmem [resolvable:$true] %s35_s28 }
   0x7   :  { %p6659_p1 = scmp.lt.u32.totalorder %s6655_s9, %s7124_s1 }
   0x9   :  { %p6661_p2 = pnand %p6659_p1, %p6656_p0 }
   0xb   :  { %6664 = shalt.err (!%p6661_p2)
}
   0xc   :  { %s6665_s14 = scalar_lea.vmem %s36_s28, 2048  ;;  %p6670_p4 = scmp.lt.s32.totalorder %s36_s28, %s36_s28 }
   0xd   :  { %p6666_p3 = scmp.ne.s32.totalorder %s36_s28, %s6665_s14  ;;  %p6671_p5 = scmp.lt.s32.totalorder %s6665_s14, %s6665_s14 }
   0xf   :  { %p6672_p6 = por %p6671_p5, %p6670_p4 }
  0x11   :  { %p6673_p7 = pnand %p6672_p6, %p6666_p3 }
  0x13   :  { %6676 = shalt.err (!%p6673_p7)
}
  0x14   :  { %s6866_s15 = smov 512   ;;  %s6867_s16 = smov 32  }
  0x15   :  { %41 = dma.hbm_to_vmem [thread:$0]  %s7124_s1, 2048, %s36_s28, [#allocation6], %s6866_s15, %s6866_s15, %s6867_s16  }
  0x16   :  { %s6868_s19 = smov [#allocation8]   ;;  %s6677_s23 = scalar_lea.hbm %s7126_s3, 65536 }
  0x17   :  { %s57_s20 = sshll.u32 %s6868_s19, 4  ;;  %p6678_p8 = scmp.ne.s32.totalorder %s7126_s3, %s6677_s23  ;;  %s58_s20 = int_to_ptr.vmem [resolvable:$true] %s57_s20 }
  0x18   :  { %p6681_p9 = scmp.lt.u32.totalorder %s6677_s23, %s7126_s3 }
  0x1a   :  { %p6683_p10 = pnand %p6681_p9, %p6678_p8 }
  0x1c   :  { %6686 = shalt.err (!%p6683_p10)
}
  0x1d   :  { %s6687_s29 = scalar_lea.vmem %s58_s20, 65536  ;;  %p6692_p12 = scmp.lt.s32.totalorder %s58_s20, %s58_s20 }
  0x1e   :  { %p6688_p11 = scmp.ne.s32.totalorder %s58_s20, %s6687_s29  ;;  %p6693_p13 = scmp.lt.s32.totalorder %s6687_s29, %s6687_s29 }
  0x20   :  { %p6694_p0 = por %p6693_p13, %p6692_p12 }
  0x22   :  { %p6695_p1 = pnand %p6694_p0, %p6688_p11 }
  0x24   :  { %6698 = shalt.err (!%p6695_p1)
}
  0x25   :  { %s6869_s1 = smov 256   ;;  %s6870_s28 = smov 16  }
  0x26   :  { %63 = dma.hbm_to_vmem [thread:$0]  %s7126_s3, 65536, %s58_s20, [#allocation9], %s6869_s1, %s6869_s1, %s6870_s28  }
  0x27   :  { %s6871_s10 = smov [#allocation11]   ;;  %s6699_s14 = scalar_lea.hbm %s7128_s5, 8192 }
  0x28   :  { %s81_s11 = sshll.u32 %s6871_s10, 4  ;;  %p6700_p2 = scmp.ne.s32.totalorder %s7128_s5, %s6699_s14  ;;  %s82_s11 = int_to_ptr.vmem [resolvable:$true] %s81_s11 }
  0x29   :  { %p6703_p3 = scmp.lt.u32.totalorder %s6699_s14, %s7128_s5 }
  0x2b   :  { %p6705_p4 = pnand %p6703_p3, %p6700_p2 }
  0x2d   :  { %6708 = shalt.err (!%p6705_p4)
}
  0x2e   :  { %s6709_s19 = scalar_lea.vmem %s82_s11, 8192  ;;  %p6714_p6 = scmp.lt.s32.totalorder %s82_s11, %s82_s11 }
  0x2f   :  { %p6710_p5 = scmp.ne.s32.totalorder %s82_s11, %s6709_s19  ;;  %p6715_p7 = scmp.lt.s32.totalorder %s6709_s19, %s6709_s19 }
  0x31   :  { %p6716_p8 = por %p6715_p7, %p6714_p6 }
  0x33   :  { %p6717_p9 = pnand %p6716_p8, %p6710_p5 }
  0x35   :  { %6720 = shalt.err (!%p6717_p9)
}
  0x36   :  { %s6872_s3 = smov 64   ;;  %s6873_s20 = smov 4  }
  0x37   :  { %87 = dma.hbm_to_vmem [thread:$0]  %s7128_s5, 8192, %s82_s11, [#allocation12], %s6872_s3, %s6872_s3, %s6873_s20  }
  0x38   :  { %s6874_s23 = smov [#allocation2]   ;;  %s6875_s25 = smov [#allocation7]  }
  0x39   :  { %s26_s24 = sshll.u32 %s6874_s23, 4  ;;  %s48_s26 = sshll.u32 %s6875_s25, 4  ;;  %s27_s24 = int_to_ptr.vmem [resolvable:$true] %s26_s24  ;;  %s49_s26 = int_to_ptr.vmem [resolvable:$true] %s48_s26 }
  0x3a   :  { %s6721_s1 = scalar_lea.hbm %s7123_s0, 32 }
  0x3b   :  { %p6722_p10 = scmp.ne.s32.totalorder %s7123_s0, %s6721_s1  ;;  %p6725_p11 = scmp.lt.u32.totalorder %s6721_s1, %s7123_s0 }
  0x3d   :  { %p6727_p12 = pnand %p6725_p11, %p6722_p10 }
  0x3f   :  { %6730 = shalt.err (!%p6727_p12)
}
  0x40   :  { %s6731_s5 = scalar_lea.vmem %s27_s24, 32  ;;  %p6736_p0 = scmp.lt.s32.totalorder %s27_s24, %s27_s24 }
  0x41   :  { %p6732_p13 = scmp.ne.s32.totalorder %s27_s24, %s6731_s5  ;;  %p6737_p1 = scmp.lt.s32.totalorder %s6731_s5, %s6731_s5 }
  0x43   :  { %p6738_p2 = por %p6737_p1, %p6736_p0 }
  0x45   :  { %p6739_p3 = pnand %p6738_p2, %p6732_p13 }
  0x47   :  { %6742 = shalt.err (!%p6739_p3)
}
  0x48   :  { %29 = dma.hbm_to_vmem [thread:$0]  %s7123_s0, 32, %s27_s24, [#allocation3]  }
  0x49   :  { %s6743_s15 = scalar_lea.hbm %s7125_s2, 128 }
  0x4a   :  { %p6744_p4 = scmp.ne.s32.totalorder %s7125_s2, %s6743_s15  ;;  %p6747_p5 = scmp.lt.u32.totalorder %s6743_s15, %s7125_s2 }
  0x4c   :  { %p6749_p6 = pnand %p6747_p5, %p6744_p4 }
  0x4e   :  { %6752 = shalt.err (!%p6749_p6)
}
  0x4f   :  { %s6753_s3 = scalar_lea.vmem %s49_s26, 128  ;;  %p6758_p8 = scmp.lt.s32.totalorder %s49_s26, %s49_s26 }
  0x50   :  { %p6754_p7 = scmp.ne.s32.totalorder %s49_s26, %s6753_s3  ;;  %p6759_p9 = scmp.lt.s32.totalorder %s6753_s3, %s6753_s3 }
  0x52   :  { %p6760_p10 = por %p6759_p9, %p6758_p8 }
  0x54   :  { %p6761_p11 = pnand %p6760_p10, %p6754_p7 }
  0x56   :  { %6764 = shalt.err (!%p6761_p11)
}
  0x57   :  { %51 = dma.hbm_to_vmem [thread:$0]  %s7125_s2, 128, %s49_s26, [#allocation6]  }
  0x58   :  { %s6876_s21 = smov [#allocation10]   ;;  %s6765_s25 = scalar_lea.hbm %s7127_s4, 256 }
  0x59   :  { %s69_s22 = sshll.u32 %s6876_s21, 4  ;;  %p6766_p12 = scmp.ne.s32.totalorder %s7127_s4, %s6765_s25  ;;  %s70_s22 = int_to_ptr.vmem [resolvable:$true] %s69_s22 }
  0x5a   :  { %p6769_p13 = scmp.lt.u32.totalorder %s6765_s25, %s7127_s4 }
  0x5c   :  { %p6771_p0 = pnand %p6769_p13, %p6766_p12 }
  0x5e   :  { %6774 = shalt.err (!%p6771_p0)
}
  0x5f   :  { %s6775_s30 = scalar_lea.vmem %s70_s22, 256  ;;  %p6780_p2 = scmp.lt.s32.totalorder %s70_s22, %s70_s22 }
  0x60   :  { %p6776_p1 = scmp.ne.s32.totalorder %s70_s22, %s6775_s30  ;;  %p6781_p3 = scmp.lt.s32.totalorder %s6775_s30, %s6775_s30 }
  0x62   :  { %p6782_p4 = por %p6781_p3, %p6780_p2 }
  0x64   :  { %p6783_p5 = pnand %p6782_p4, %p6776_p1 }
  0x66   :  { %6786 = shalt.err (!%p6783_p5)
}
  0x67   :  { %s6877_s2 = smov 128   ;;  %s6878_s26 = smov 8  }
  0x68   :  { %75 = dma.hbm_to_vmem [thread:$0]  %s7127_s4, 256, %s70_s22, [#allocation9], %s6877_s2, %s6877_s2, %s6878_s26  }
  0x69   :  { %s6879_s5 = smov [#allocation13]   ;;  %s6787_s14 = scalar_lea.hbm %s7129_s6, 32 }
  0x6a   :  { %s94_s11 = sshll.u32 %s6879_s5, 4  ;;  %p6788_p6 = scmp.ne.s32.totalorder %s7129_s6, %s6787_s14  ;;  %s95_s11 = int_to_ptr.vmem [resolvable:$true] %s94_s11 }
  0x6b   :  { %p6791_p7 = scmp.lt.u32.totalorder %s6787_s14, %s7129_s6 }
  0x6d   :  { %p6793_p8 = pnand %p6791_p7, %p6788_p6 }
  0x6f   :  { %6796 = shalt.err (!%p6793_p8)
}
  0x70   :  { %s6797_s19 = scalar_lea.vmem %s95_s11, 32  ;;  %p6802_p10 = scmp.lt.s32.totalorder %s95_s11, %s95_s11 }
  0x71   :  { %p6798_p9 = scmp.ne.s32.totalorder %s95_s11, %s6797_s19  ;;  %p6803_p11 = scmp.lt.s32.totalorder %s6797_s19, %s6797_s19 }
  0x73   :  { %p6804_p12 = por %p6803_p11, %p6802_p10 }
  0x75   :  { %p6805_p13 = pnand %p6804_p12, %p6798_p9 }
  0x77   :  { %6808 = shalt.err (!%p6805_p13)
}
  0x78   :  { %97 = dma.hbm_to_vmem [thread:$0]  %s7129_s6, 32, %s95_s11, [#allocation12]  }
  0x79   :  { %6853 = dma.done.wait [#allocation3], 32  }
  0x7a   :  { %6854 = vsyncadd [#allocation3], 4294967264 }
  0x7b   :  { %6855 = dma.done.wait [#allocation6], 2176  }
  0x7c   :  { %6856 = vsyncadd [#allocation6], 4294965120 }
  0x7d   :  { %6857 = dma.done.wait [#allocation9], 65792  }
  0x7e   :  { %6858 = vsyncadd [#allocation9], 4294901504 }
  0x7f   :  { %6859 = dma.done.wait [#allocation12], 8224  }
  0x80   :  { %6860 = vsyncadd [#allocation12], 4294959072  ;;  %v6880_v0 = vmov 0   ;;  %v122_v1 = vld [vmem:[#allocation5] sm:$0xff]  ;;  %v123_v7 = vld [vmem:[#allocation5 + $0x8] sm:$0xff]  ;;  %vm260_vm0 = vcmask 261120  }
  0x81   :  { %296 = vmatprep.mubr.bf16.mxu0 %v6880_v0  ;;  %337 = vmatprep.mubr.bf16.mxu1 %v6880_v0  ;;  %v126_v2 = vld [vmem:[#allocation5 + $0x20] sm:$0xff]  ;;  %v127_v9 = vld [vmem:[#allocation5 + $0x28] sm:$0xff]  ;;  %v124_v15 = vld [vmem:[#allocation5 + $0x10] sm:$0xff]  ;;  %s6881_s6 = smov [#allocation14]  }
  0x82   :  { %v130_v3 = vld [vmem:[#allocation5 + $0x40] sm:$0xff]  ;;  %v5019_v4 = vcombine.high %v122_v1, %v126_v2  ;;  %v5018_v5 = vcombine.low %v122_v1, %v126_v2  ;;  %v131_v10 = vld [vmem:[#allocation5 + $0x48] sm:$0xff]  ;;  %v5021_v12 = vcombine.high %v123_v7, %v127_v9  ;;  %v5020_v13 = vcombine.low %v123_v7, %v127_v9  ;;  %v128_v16 = vld [vmem:[#allocation5 + $0x30] sm:$0xff]  ;;  %s4991_s0 = sshll.u32 %s6881_s6, 4  ;;  %s4992_s0 = int_to_ptr.vmem [resolvable:$true] %s4991_s0 }
  0x83   :  { %v134_v6 = vld [vmem:[#allocation5 + $0x60] sm:$0xff]  ;;  %v135_v11 = vld [vmem:[#allocation5 + $0x68] sm:$0xff]  ;;  %v120_v18 = vld [vmem:[#allocation2] sm:$0x3]  ;;  %v5023_v21 = vcombine.high %v124_v15, %v128_v16  ;;  %v5022_v28 = vcombine.low %v124_v15, %v128_v16  ;;  %s6809_s20 = scalar_lea.vmem %s4992_s0, 32  ;;  %p6814_p1 = scmp.lt.s32.totalorder %s4992_s0, %s4992_s0 }
  0x84   :  { %v5027_v8 = vcombine.high %v130_v3, %v134_v6  ;;  %264 = vmatprep.subr.bf16.mxu0 %v5019_v4  ;;  %v5029_v14 = vcombine.high %v131_v10, %v135_v11  ;;  %v5026_v17 = vcombine.low %v130_v3, %v134_v6  ;;  %v125_v19 = vld [vmem:[#allocation5 + $0x18] sm:$0xff]  ;;  %305 = vmatprep.subr.bf16.mxu1 %v5021_v12  ;;  %v132_v23 = vld [vmem:[#allocation5 + $0x50] sm:$0xff]  ;;  %p6810_p0 = scmp.ne.s32.totalorder %s4992_s0, %s6809_s20  ;;  %p6815_p2 = scmp.lt.s32.totalorder %s6809_s20, %s6809_s20 }
  0x85   :  { %265 = vmatpush1.bf16.msra.mxu0 %v5018_v5  ;;  %v129_v20 = vld [vmem:[#allocation5 + $0x38] sm:$0xff]  ;;  %306 = vmatpush1.bf16.msra.mxu1 %v5020_v13  ;;  %v5028_v22 = vcombine.low %v131_v10, %v135_v11  ;;  %v136_v24 = vld [vmem:[#allocation5 + $0x70] sm:$0xff]  ;;  %v121_v25 = vpack.c.bf16 %v120_v18, %v120_v18 }
  0x86   :  { %266 = vmatprep.subr.bf16.mxu0 %v5027_v8  ;;  %307 = vmatprep.subr.bf16.mxu1 %v5029_v14  ;;  %v5025_v26 = vcombine.high %v125_v19, %v129_v20  ;;  %v133_v27 = vld [vmem:[#allocation5 + $0x58] sm:$0xff]  ;;  %v5031_v30 = vcombine.high %v132_v23, %v136_v24  ;;  %v5024_v31 = vcombine.low %v125_v19, %v129_v20  ;;  %v5775_v36 = vld [vmem:[#allocation8 + $0xc] ss:$16 sps:$4 sm:$0xff]   ;;  %v5773_v39 = vld [vmem:[#allocation8 + $0x8] ss:$16 sps:$4 sm:$0xff]   ;;  %p6816_p3 = por %p6815_p2, %p6814_p1 }
  0x87   :  { %v137_v29 = vld [vmem:[#allocation5 + $0x78] sm:$0xff]  ;;  %v5030_v33 = vcombine.low %v132_v23, %v136_v24  ;;  %v5781_v40 = vld [vmem:[#allocation8 + $0x2c] ss:$16 sps:$4 sm:$0xff]   ;;  %v5779_v43 = vld [vmem:[#allocation8 + $0x28] ss:$16 sps:$4 sm:$0xff]  }
  0x88   :  { %v5033_v32 = vcombine.high %v133_v27, %v137_v29  ;;  %v5772_v34 = vld [vmem:[#allocation8 + $0x4] ss:$16 sps:$4 sm:$0xff]   ;;  %v5032_v35 = vcombine.low %v133_v27, %v137_v29  ;;  %v5770_v37 = vld [vmem:[#allocation8] ss:$16 sps:$4 sm:$0xff]   ;;  %v5787_v44 = vld [vmem:[#allocation8 + $0x4c] ss:$16 sps:$4 sm:$0xff]   ;;  %p6817_p4 = pnand %p6816_p3, %p6810_p0 }
  0x89   :  { %267 = vmatpush1.bf16.msra.mxu0 %v5026_v17  ;;  %308 = vmatpush1.bf16.msra.mxu1 %v5028_v22  ;;  %v5778_v38 = vld [vmem:[#allocation8 + $0x24] ss:$16 sps:$4 sm:$0xff]   ;;  %v5776_v41 = vld [vmem:[#allocation8 + $0x20] ss:$16 sps:$4 sm:$0xff]   ;;  %v5785_v47 = vld [vmem:[#allocation8 + $0x48] ss:$16 sps:$4 sm:$0xff]  }
  0x8a   :  { %346 = vmatprep.subr.bf16.mxu0 %v5023_v21  ;;  %387 = vmatprep.subr.bf16.mxu1 %v5025_v26  ;;  %v5784_v42 = vld [vmem:[#allocation8 + $0x44] ss:$16 sps:$4 sm:$0xff]   ;;  %v5782_v45 = vld [vmem:[#allocation8 + $0x40] ss:$16 sps:$4 sm:$0xff]   ;;  %v5793_v48 = vld [vmem:[#allocation8 + $0x6c] ss:$16 sps:$4 sm:$0xff]  }
  0x8b   :  { %v5790_v46 = vld [vmem:[#allocation8 + $0x64] ss:$16 sps:$4 sm:$0xff]   ;;  %v5788_v49 = vld [vmem:[#allocation8 + $0x60] ss:$16 sps:$4 sm:$0xff]   ;;  %v5791_v51 = vld [vmem:[#allocation8 + $0x68] ss:$16 sps:$4 sm:$0xff]  }
  0x8c   :  { %5034 = vmatmul.mubr.msk.bf16.vlgmr.msra.gmra.mrb[0].mxu0 %vm260_vm0, %v121_v25  ;;  %5035 = vmatmul.mubr.msk.bf16.vlgmr.msra.gmra.mrb[0].mxu1 %vm260_vm0, %v121_v25  ;;  %v5796_v50 = vld [vmem:[#allocation8 + $0x84] ss:$16 sps:$4 sm:$0xff]   ;;  %v5799_v52 = vld [vmem:[#allocation8 + $0x8c] ss:$16 sps:$4 sm:$0xff]   ;;  %v5794_v53 = vld [vmem:[#allocation8 + $0x80] ss:$16 sps:$4 sm:$0xff]  }
  0x8d   :  { %347 = vmatpush1.bf16.msra.mxu0 %v5022_v28  ;;  %378 = vmatprep.mubr.bf16.mxu0 %v6880_v0  ;;  %v5802_v54 = vld [vmem:[#allocation8 + $0xa4] ss:$16 sps:$4 sm:$0xff]   ;;  %v5797_v55 = vld [vmem:[#allocation8 + $0x88] ss:$16 sps:$4 sm:$0xff]   ;;  %v5805_v56 = vld [vmem:[#allocation8 + $0xac] ss:$16 sps:$4 sm:$0xff]  }
  0x8e   :  { %348 = vmatprep.subr.bf16.mxu0 %v5031_v30  ;;  %388 = vmatpush1.bf16.msra.mxu1 %v5024_v31  ;;  %v5800_v57 = vld [vmem:[#allocation8 + $0xa0] ss:$16 sps:$4 sm:$0xff]   ;;  %v5803_v58 = vld [vmem:[#allocation8 + $0xa8] ss:$16 sps:$4 sm:$0xff]   ;;  %v5808_v59 = vld [vmem:[#allocation8 + $0xc4] ss:$16 sps:$4 sm:$0xff]  }
  0x8f   :  { %419 = vmatprep.mubr.bf16.mxu1 %v6880_v0  ;;  %389 = vmatprep.subr.bf16.mxu1 %v5033_v32  ;;  %v5811_v60 = vld [vmem:[#allocation8 + $0xcc] ss:$16 sps:$4 sm:$0xff]   ;;  %v5806_v61 = vld [vmem:[#allocation8 + $0xc0] ss:$16 sps:$4 sm:$0xff]   ;;  %v5814_v62 = vld [vmem:[#allocation8 + $0xe4] ss:$16 sps:$4 sm:$0xff]  }
  0x90   :  { %v5809_v63 = vld [vmem:[#allocation8 + $0xc8] ss:$16 sps:$4 sm:$0xff]   ;;  %v5817_v0 = vld [vmem:[#allocation8 + $0xec] ss:$16 sps:$4 sm:$0xff]   ;;  %v5812_v1 = vld [vmem:[#allocation8 + $0xe0] ss:$16 sps:$4 sm:$0xff]  }
  0x91   :  { %349 = vmatpush1.bf16.msra.mxu0 %v5030_v33  ;;  %v5820_v2 = vld [vmem:[#allocation8 + $0x104] ss:$16 sps:$4 sm:$0xff]   ;;  %v5815_v3 = vld [vmem:[#allocation8 + $0xe8] ss:$16 sps:$4 sm:$0xff]   ;;  %v5823_v4 = vld [vmem:[#allocation8 + $0x10c] ss:$16 sps:$4 sm:$0xff]  }
  0x92   :  { %1230 = vmatprep.subr.bf16.mxu0 %v5772_v34  ;;  %390 = vmatpush1.bf16.msra.mxu1 %v5032_v35  ;;  %v5818_v5 = vld [vmem:[#allocation8 + $0x100] ss:$16 sps:$4 sm:$0xff]   ;;  %v5826_v6 = vld [vmem:[#allocation8 + $0x124] ss:$16 sps:$4 sm:$0xff]   ;;  %v5821_v7 = vld [vmem:[#allocation8 + $0x108] ss:$16 sps:$4 sm:$0xff]  }
  0x93   :  { %1312 = vmatprep.subr.bf16.mxu1 %v5775_v36  ;;  %v5829_v8 = vld [vmem:[#allocation8 + $0x12c] ss:$16 sps:$4 sm:$0xff]   ;;  %v5824_v9 = vld [vmem:[#allocation8 + $0x120] ss:$16 sps:$4 sm:$0xff]   ;;  %v5832_v10 = vld [vmem:[#allocation8 + $0x144] ss:$16 sps:$4 sm:$0xff]  }
  0x94   :  { %5036 = vmatmul.mubr.msk.bf16.vlgmr.msra.gmra.mrb[4].mxu0 %vm260_vm0, %v121_v25  ;;  %v5827_v11 = vld [vmem:[#allocation8 + $0x128] ss:$16 sps:$4 sm:$0xff]   ;;  %v5835_v12 = vld [vmem:[#allocation8 + $0x14c] ss:$16 sps:$4 sm:$0xff]   ;;  %v5830_v13 = vld [vmem:[#allocation8 + $0x140] ss:$16 sps:$4 sm:$0xff]  }
  0x95   :  { %1231 = vmatpush1.bf16.msra.mxu0 %v5770_v37  ;;  %5037 = vmatmul.mubr.msk.bf16.vlgmr.msra.gmra.mrb[4].mxu1 %vm260_vm0, %v121_v25  ;;  %v5838_v14 = vld [vmem:[#allocation8 + $0x164] ss:$16 sps:$4 sm:$0xff]   ;;  %v5833_v15 = vld [vmem:[#allocation8 + $0x148] ss:$16 sps:$4 sm:$0xff]   ;;  %v5841_v16 = vld [vmem:[#allocation8 + $0x16c] ss:$16 sps:$4 sm:$0xff]   ;;  %v140_v37 = vlaneseq }
  0x96   :  { %1232 = vmatprep.subr.bf16.mxu0 %v5778_v38  ;;  %1313 = vmatpush1.bf16.msra.mxu1 %v5773_v39  ;;  %v5836_v17 = vld [vmem:[#allocation8 + $0x160] ss:$16 sps:$4 sm:$0xff]   ;;  %v5839_v18 = vld [vmem:[#allocation8 + $0x168] ss:$16 sps:$4 sm:$0xff]   ;;  %v5844_v19 = vld [vmem:[#allocation8 + $0x184] ss:$16 sps:$4 sm:$0xff]  }
  0x97   :  { %1314 = vmatprep.subr.bf16.mxu1 %v5781_v40  ;;  %v5847_v20 = vld [vmem:[#allocation8 + $0x18c] ss:$16 sps:$4 sm:$0xff]   ;;  %v5842_v21 = vld [vmem:[#allocation8 + $0x180] ss:$16 sps:$4 sm:$0xff]   ;;  %v5845_v22 = vld [vmem:[#allocation8 + $0x188] ss:$16 sps:$4 sm:$0xff]  }
  0x98   :  { %v5850_v23 = vld [vmem:[#allocation8 + $0x1a4] ss:$16 sps:$4 sm:$0xff]   ;;  %v5853_v24 = vld [vmem:[#allocation8 + $0x1ac] ss:$16 sps:$4 sm:$0xff]   ;;  %v5848_v25 = vld [vmem:[#allocation8 + $0x1a0] ss:$16 sps:$4 sm:$0xff]  }
  0x99   :  { %1233 = vmatpush1.bf16.msra.mxu0 %v5776_v41  ;;  %v5851_v26 = vld [vmem:[#allocation8 + $0x1a8] ss:$16 sps:$4 sm:$0xff]   ;;  %v5856_v27 = vld [vmem:[#allocation8 + $0x1c4] ss:$16 sps:$4 sm:$0xff]   ;;  %v5859_v28 = vld [vmem:[#allocation8 + $0x1cc] ss:$16 sps:$4 sm:$0xff]  }
  0x9a   :  { %1234 = vmatprep.subr.bf16.mxu0 %v5784_v42  ;;  %1315 = vmatpush1.bf16.msra.mxu1 %v5779_v43  ;;  %v5854_v29 = vld [vmem:[#allocation8 + $0x1c0] ss:$16 sps:$4 sm:$0xff]   ;;  %v5857_v30 = vld [vmem:[#allocation8 + $0x1c8] ss:$16 sps:$4 sm:$0xff]   ;;  %v5862_v31 = vld [vmem:[#allocation8 + $0x1e4] ss:$16 sps:$4 sm:$0xff]  }
  0x9b   :  { %1316 = vmatprep.subr.bf16.mxu1 %v5787_v44  ;;  %v5865_v32 = vld [vmem:[#allocation8 + $0x1ec] ss:$16 sps:$4 sm:$0xff]   ;;  %v5860_v33 = vld [vmem:[#allocation8 + $0x1e0] ss:$16 sps:$4 sm:$0xff]   ;;  %v5863_v34 = vld [vmem:[#allocation8 + $0x1e8] ss:$16 sps:$4 sm:$0xff]  }
  0x9c   :  { %v5868_v35 = vld [vmem:[#allocation8 + $0x204] ss:$16 sps:$4 sm:$0xff]   ;;  %v5871_v36 = vld [vmem:[#allocation8 + $0x20c] ss:$16 sps:$4 sm:$0xff]   ;;  %v7016_v38 = vshrl.u32 %v140_v37, 7 }
  0x9d   :  { %1235 = vmatpush1.bf16.msra.mxu0 %v5782_v45  ;;  %v7018_v39 = vld [vmem:[#allocation7] sm:$0xff] }
  0x9e   :  { %1236 = vmatprep.subr.bf16.mxu0 %v5790_v46  ;;  %1317 = vmatpush1.bf16.msra.mxu1 %v5785_v47  ;;  %v7021_v40 = vsub.s32 0, %v7016_v38  ;;  %v7024_v41 = vsub.s32 1, %v7016_v38  ;;  %v7027_v42 = vsub.s32 3, %v7016_v38  ;;  %v5911_v37 = vld [vmem:[#allocation8 + $0x2e8] ss:$16 sps:$4 sm:$0xff]  }
  0x9f   :  { %1318 = vmatprep.subr.bf16.mxu1 %v5793_v48 }
  0xa0   :  { %v143_v43 = vrot.slane %v7018_v39, %v7021_v40  ;;  %v147_v44 = vrot.slane %v7018_v39, %v7024_v41  ;;  %v155_v46 = vrot.slane %v7018_v39, %v7027_v42 }
  0xa1   :  { %1237 = vmatpush1.bf16.msra.mxu0 %v5788_v49 }
  0xa2   :  { %1238 = vmatprep.subr.bf16.mxu0 %v5796_v50  ;;  %1319 = vmatpush1.bf16.msra.mxu1 %v5791_v51 }
  0xa3   :  { %1320 = vmatprep.subr.bf16.mxu1 %v5799_v52 }
  0xa5   :  { %1239 = vmatpush1.bf16.msra.mxu0 %v5794_v53 }
  0xa6   :  { %1240 = vmatprep.subr.bf16.mxu0 %v5802_v54  ;;  %1321 = vmatpush1.bf16.msra.mxu1 %v5797_v55 }
  0xa7   :  { %1322 = vmatprep.subr.bf16.mxu1 %v5805_v56 }
  0xa9   :  { %1241 = vmatpush1.bf16.msra.mxu0 %v5800_v57 }
  0xaa   :  { %1242 = vmatprep.subr.bf16.mxu0 %v5808_v59  ;;  %1323 = vmatpush1.bf16.msra.mxu1 %v5803_v58 }
  0xab   :  { %1324 = vmatprep.subr.bf16.mxu1 %v5811_v60 }
  0xad   :  { %1243 = vmatpush1.bf16.msra.mxu0 %v5806_v61 }
  0xae   :  { %1244 = vmatprep.subr.bf16.mxu0 %v5814_v62  ;;  %1325 = vmatpush1.bf16.msra.mxu1 %v5809_v63 }
  0xaf   :  { %1326 = vmatprep.subr.bf16.mxu1 %v5817_v0 }
  0xb1   :  { %1245 = vmatpush1.bf16.msra.mxu0 %v5812_v1  ;;  %v5866_v1 = vld [vmem:[#allocation8 + $0x200] ss:$16 sps:$4 sm:$0xff]  }
  0xb2   :  { %1246 = vmatprep.subr.bf16.mxu0 %v5820_v2  ;;  %1327 = vmatpush1.bf16.msra.mxu1 %v5815_v3  ;;  %v5869_v2 = vld [vmem:[#allocation8 + $0x208] ss:$16 sps:$4 sm:$0xff]  }
  0xb3   :  { %1328 = vmatprep.subr.bf16.mxu1 %v5823_v4 }
  0xb5   :  { %1247 = vmatpush1.bf16.msra.mxu0 %v5818_v5  ;;  %v5874_v5 = vld [vmem:[#allocation8 + $0x224] ss:$16 sps:$4 sm:$0xff]  }
  0xb6   :  { %1248 = vmatprep.subr.bf16.mxu0 %v5826_v6  ;;  %1329 = vmatpush1.bf16.msra.mxu1 %v5821_v7  ;;  %v5877_v6 = vld [vmem:[#allocation8 + $0x22c] ss:$16 sps:$4 sm:$0xff]  }
  0xb7   :  { %1330 = vmatprep.subr.bf16.mxu1 %v5829_v8 }
  0xb9   :  { %1249 = vmatpush1.bf16.msra.mxu0 %v5824_v9 }
  0xba   :  { %1250 = vmatprep.subr.bf16.mxu0 %v5832_v10  ;;  %1331 = vmatpush1.bf16.msra.mxu1 %v5827_v11  ;;  %v5872_v10 = vld [vmem:[#allocation8 + $0x220] ss:$16 sps:$4 sm:$0xff]   ;;  %v5875_v11 = vld [vmem:[#allocation8 + $0x228] ss:$16 sps:$4 sm:$0xff]  }
  0xbb   :  { %1332 = vmatprep.subr.bf16.mxu1 %v5835_v12 }
  0xbd   :  { %1251 = vmatpush1.bf16.msra.mxu0 %v5830_v13  ;;  %v5880_v13 = vld [vmem:[#allocation8 + $0x244] ss:$16 sps:$4 sm:$0xff]  }
  0xbe   :  { %1252 = vmatprep.subr.bf16.mxu0 %v5838_v14  ;;  %1333 = vmatpush1.bf16.msra.mxu1 %v5833_v15  ;;  %v5883_v14 = vld [vmem:[#allocation8 + $0x24c] ss:$16 sps:$4 sm:$0xff]   ;;  %v5878_v15 = vld [vmem:[#allocation8 + $0x240] ss:$16 sps:$4 sm:$0xff]  }
  0xbf   :  { %1334 = vmatprep.subr.bf16.mxu1 %v5841_v16  ;;  %v5881_v16 = vld [vmem:[#allocation8 + $0x248] ss:$16 sps:$4 sm:$0xff]  }
  0xc1   :  { %1253 = vmatpush1.bf16.msra.mxu0 %v5836_v17  ;;  %v5886_v17 = vld [vmem:[#allocation8 + $0x264] ss:$16 sps:$4 sm:$0xff]  }
  0xc2   :  { %1335 = vmatpush1.bf16.msra.mxu1 %v5839_v18  ;;  %1254 = vmatprep.subr.bf16.mxu0 %v5844_v19  ;;  %v5889_v18 = vld [vmem:[#allocation8 + $0x26c] ss:$16 sps:$4 sm:$0xff]   ;;  %v5884_v19 = vld [vmem:[#allocation8 + $0x260] ss:$16 sps:$4 sm:$0xff]  }
  0xc3   :  { %1336 = vmatprep.subr.bf16.mxu1 %v5847_v20  ;;  %v5887_v20 = vld [vmem:[#allocation8 + $0x268] ss:$16 sps:$4 sm:$0xff]  }
  0xc5   :  { %1255 = vmatpush1.bf16.msra.mxu0 %v5842_v21  ;;  %v5892_v21 = vld [vmem:[#allocation8 + $0x284] ss:$16 sps:$4 sm:$0xff]  }
  0xc6   :  { %1337 = vmatpush1.bf16.msra.mxu1 %v5845_v22  ;;  %1256 = vmatprep.subr.bf16.mxu0 %v5850_v23  ;;  %v5895_v22 = vld [vmem:[#allocation8 + $0x28c] ss:$16 sps:$4 sm:$0xff]   ;;  %v5890_v23 = vld [vmem:[#allocation8 + $0x280] ss:$16 sps:$4 sm:$0xff]  }
  0xc7   :  { %1338 = vmatprep.subr.bf16.mxu1 %v5853_v24  ;;  %v5893_v24 = vld [vmem:[#allocation8 + $0x288] ss:$16 sps:$4 sm:$0xff]  }
  0xc9   :  { %1257 = vmatpush1.bf16.msra.mxu0 %v5848_v25  ;;  %v5898_v25 = vld [vmem:[#allocation8 + $0x2a4] ss:$16 sps:$4 sm:$0xff]  }
  0xca   :  { %1339 = vmatpush1.bf16.msra.mxu1 %v5851_v26  ;;  %1258 = vmatprep.subr.bf16.mxu0 %v5856_v27  ;;  %v5901_v26 = vld [vmem:[#allocation8 + $0x2ac] ss:$16 sps:$4 sm:$0xff]   ;;  %v5896_v27 = vld [vmem:[#allocation8 + $0x2a0] ss:$16 sps:$4 sm:$0xff]  }
  0xcb   :  { %1340 = vmatprep.subr.bf16.mxu1 %v5859_v28  ;;  %v5899_v28 = vld [vmem:[#allocation8 + $0x2a8] ss:$16 sps:$4 sm:$0xff]  }
  0xcd   :  { %1259 = vmatpush1.bf16.msra.mxu0 %v5854_v29  ;;  %v5904_v29 = vld [vmem:[#allocation8 + $0x2c4] ss:$16 sps:$4 sm:$0xff]  }
  0xce   :  { %1341 = vmatpush1.bf16.msra.mxu1 %v5857_v30  ;;  %1260 = vmatprep.subr.bf16.mxu0 %v5862_v31  ;;  %v5907_v30 = vld [vmem:[#allocation8 + $0x2cc] ss:$16 sps:$4 sm:$0xff]   ;;  %v7046_v31 = vsub.s32 2, %v7016_v38 }
  0xcf   :  { %1342 = vmatprep.subr.bf16.mxu1 %v5865_v32  ;;  %v5902_v32 = vld [vmem:[#allocation8 + $0x2c0] ss:$16 sps:$4 sm:$0xff]  }
  0xd1   :  { %1261 = vmatpush1.bf16.msra.mxu0 %v5860_v33  ;;  %v5905_v33 = vld [vmem:[#allocation8 + $0x2c8] ss:$16 sps:$4 sm:$0xff]  }
  0xd2   :  { %1343 = vmatpush1.bf16.msra.mxu1 %v5863_v34  ;;  %1271 = vmatprep.subr.bf16.mxu0 %v5868_v35  ;;  %v5910_v34 = vld [vmem:[#allocation8 + $0x2e4] ss:$16 sps:$4 sm:$0xff]   ;;  %v5913_v35 = vld [vmem:[#allocation8 + $0x2ec] ss:$16 sps:$4 sm:$0xff]  }
  0xd3   :  { %1353 = vmatprep.subr.bf16.mxu1 %v5871_v36  ;;  %v5908_v36 = vld [vmem:[#allocation8 + $0x2e0] ss:$16 sps:$4 sm:$0xff]  }
 0x15f   :  { %v298_v45 = vpop.f32.mrb[0].mxu0  ;;  %v7035_v51 = vpop.f32.mrb[0].mxu1 }
 0x160   :  { %v299_v47 = vadd.f32 %v298_v45, %v143_v43  ;;  %v300_v48 = vpop.f32.mrb[1].mxu0  ;;  %v341_v53 = vpop.f32.mrb[1].mxu1  ;;  %v5916_v43 = vld [vmem:[#allocation8 + $0x304] ss:$16 sps:$4 sm:$0xff]   ;;  %v5914_v45 = vld [vmem:[#allocation8 + $0x300] ss:$16 sps:$4 sm:$0xff]  }
 0x161   :  { %v301_v49 = vadd.f32 %v300_v48, %v147_v44  ;;  %v302_v50 = vpop.f32.mrb[2].mxu0  ;;  %v342_v54 = vadd.f32 %v341_v53, %v155_v46  ;;  %v343_v55 = vpop.f32.mrb[2].mxu1  ;;  %v5919_v44 = vld [vmem:[#allocation8 + $0x30c] ss:$16 sps:$4 sm:$0xff]   ;;  %v5917_v46 = vld [vmem:[#allocation8 + $0x308] ss:$16 sps:$4 sm:$0xff]  }
 0x162   :  { %6602 = vtanh.f32 %v299_v47  ;;  %v303_v52 = vpop.f32.mrb[3].mxu0  ;;  %v344_v56 = vpop.f32.mrb[3].mxu1  ;;  %v5922_v47 = vld [vmem:[#allocation8 + $0x324] ss:$16 sps:$4 sm:$0xff]   ;;  %v5925_v48 = vld [vmem:[#allocation8 + $0x32c] ss:$16 sps:$4 sm:$0xff]  }
 0x163   :  { %6604 = vtanh.f32 %v301_v49  ;;  %v5920_v49 = vld [vmem:[#allocation8 + $0x320] ss:$16 sps:$4 sm:$0xff]   ;;  %v5923_v50 = vld [vmem:[#allocation8 + $0x328] ss:$16 sps:$4 sm:$0xff]   ;;  %v5928_v52 = vld [vmem:[#allocation8 + $0x344] ss:$16 sps:$4 sm:$0xff]  }
 0x164   :  { %6606 = vtanh.f32 %v342_v54  ;;  %v5931_v53 = vld [vmem:[#allocation8 + $0x34c] ss:$16 sps:$4 sm:$0xff]   ;;  %v5926_v54 = vld [vmem:[#allocation8 + $0x340] ss:$16 sps:$4 sm:$0xff]   ;;  %v5929_v55 = vld [vmem:[#allocation8 + $0x348] ss:$16 sps:$4 sm:$0xff]  }
 0x165   :  { %v5934_v56 = vld [vmem:[#allocation8 + $0x364] ss:$16 sps:$4 sm:$0xff]  }
 0x167   :  { %v7037_v57 = vpop.f32.mrb[4].mxu0 }
 0x168   :  { %v7039_v58 = vpop.f32.mrb[5].mxu0  ;;  %v7041_v60 = vpop.f32.mrb[4].mxu1 }
 0x169   :  { %v384_v59 = vpop.f32.mrb[6].mxu0  ;;  %v7043_v62 = vpop.f32.mrb[5].mxu1 }
 0x16a   :  { %v385_v61 = vpop.f32.mrb[7].mxu0  ;;  %v425_v63 = vpop.f32.mrb[6].mxu1  ;;  %v5937_v59 = vld [vmem:[#allocation8 + $0x36c] ss:$16 sps:$4 sm:$0xff]  }
 0x16b   :  { %v426_v3 = vpop.f32.mrb[7].mxu1  ;;  %v151_v61 = vrot.slane %v7018_v39, %v7046_v31  ;;  %v5932_v63 = vld [vmem:[#allocation8 + $0x360] ss:$16 sps:$4 sm:$0xff]  }
 0x16c   :  { %v6603_v0 = vpop.eup %6602  ;;  %v5944_v39 = vld [vmem:[#allocation8 + $0x3a0] ss:$16 sps:$4 sm:$0xff]  }
 0x16d   :  { %v6605_v4 = vpop.eup %6604  ;;  %v436_v9 = vpack.c.bf16 %v6603_v0, %v6603_v0  ;;  %v5935_v0 = vld [vmem:[#allocation8 + $0x368] ss:$16 sps:$4 sm:$0xff]   ;;  %v340_v3 = vadd.f32 %v7035_v51, %v151_v61  ;;  %v5950_v51 = vld [vmem:[#allocation8 + $0x3c0] ss:$16 sps:$4 sm:$0xff]   ;;  %v6015_v61 = vld [vmem:[#allocation8 + $0x50c] ss:$16 sps:$4 sm:$0xff]  }
 0x16e   :  { %v437_v7 = vpack.c.bf16 %v6605_v4, %v6605_v4  ;;  %v6607_v8 = vpop.eup %6606  ;;  %v5938_v4 = vld [vmem:[#allocation8 + $0x380] ss:$16 sps:$4 sm:$0xff]  }
 0x16f   :  { %v439_v12 = vpack.c.bf16 %v6607_v8, %v6607_v8  ;;  %6608 = vtanh.f32 %v340_v3  ;;  %v5947_v8 = vld [vmem:[#allocation8 + $0x3a8] ss:$16 sps:$4 sm:$0xff]   ;;  %v6016_v3 = vld [vmem:[#allocation8 + $0x520] ss:$16 sps:$4 sm:$0xff]  }
 0x170   :  { %1262 = vmatprep.mubr.bf16.mxu0 %v437_v7  ;;  %1344 = vmatprep.mubr.bf16.mxu1 %v437_v7  ;;  %v5949_v7 = vld [vmem:[#allocation8 + $0x3ac] ss:$16 sps:$4 sm:$0xff]  }
 0x171   :  { %1263 = vmatmul.mubr.bf16.vlgmr.msra.gmra.mrb[8].mxu0 %v436_v9  ;;  %1345 = vmatmul.mubr.bf16.vlgmr.msra.gmra.mrb[8].mxu1 %v436_v9  ;;  %v5952_v9 = vld [vmem:[#allocation8 + $0x3c4] ss:$16 sps:$4 sm:$0xff]  }
 0x172   :  { %1272 = vmatpush1.bf16.msra.mxu0 %v5866_v1  ;;  %1354 = vmatpush1.bf16.msra.mxu1 %v5869_v2  ;;  %v5940_v1 = vld [vmem:[#allocation8 + $0x384] ss:$16 sps:$4 sm:$0xff]   ;;  %v5943_v2 = vld [vmem:[#allocation8 + $0x38c] ss:$16 sps:$4 sm:$0xff]  }
 0x173   :  { %1273 = vmatprep.subr.bf16.mxu0 %v5874_v5  ;;  %1355 = vmatprep.subr.bf16.mxu1 %v5877_v6  ;;  %v5941_v5 = vld [vmem:[#allocation8 + $0x388] ss:$16 sps:$4 sm:$0xff]   ;;  %v5946_v6 = vld [vmem:[#allocation8 + $0x3a4] ss:$16 sps:$4 sm:$0xff]  }
 0x174   :  { %1303 = vmatprep.mubr.bf16.mxu0 %v439_v12  ;;  %1385 = vmatprep.mubr.bf16.mxu1 %v439_v12  ;;  %v5958_v12 = vld [vmem:[#allocation8 + $0x3e4] ss:$16 sps:$4 sm:$0xff]  }
 0x176   :  { %1274 = vmatpush1.bf16.msra.mxu0 %v5872_v10  ;;  %1356 = vmatpush1.bf16.msra.mxu1 %v5875_v11  ;;  %v5955_v10 = vld [vmem:[#allocation8 + $0x3cc] ss:$16 sps:$4 sm:$0xff]   ;;  %v5953_v11 = vld [vmem:[#allocation8 + $0x3c8] ss:$16 sps:$4 sm:$0xff]  }
 0x177   :  { %1275 = vmatprep.subr.bf16.mxu0 %v5880_v13  ;;  %1357 = vmatprep.subr.bf16.mxu1 %v5883_v14  ;;  %v5961_v13 = vld [vmem:[#allocation8 + $0x3ec] ss:$16 sps:$4 sm:$0xff]   ;;  %v5956_v14 = vld [vmem:[#allocation8 + $0x3e0] ss:$16 sps:$4 sm:$0xff]  }
 0x17a   :  { %1276 = vmatpush1.bf16.msra.mxu0 %v5878_v15  ;;  %1358 = vmatpush1.bf16.msra.mxu1 %v5881_v16  ;;  %v5959_v15 = vld [vmem:[#allocation8 + $0x3e8] ss:$16 sps:$4 sm:$0xff]   ;;  %v5964_v16 = vld [vmem:[#allocation8 + $0x404] ss:$16 sps:$4 sm:$0xff]  }
 0x17b   :  { %1277 = vmatprep.subr.bf16.mxu0 %v5886_v17  ;;  %1359 = vmatprep.subr.bf16.mxu1 %v5889_v18  ;;  %v5967_v17 = vld [vmem:[#allocation8 + $0x40c] ss:$16 sps:$4 sm:$0xff]   ;;  %v6609_v18 = vpop.eup %6608 }
 0x17e   :  { %1278 = vmatpush1.bf16.msra.mxu0 %v5884_v19  ;;  %1360 = vmatpush1.bf16.msra.mxu1 %v5887_v20  ;;  %v5962_v19 = vld [vmem:[#allocation8 + $0x400] ss:$16 sps:$4 sm:$0xff]   ;;  %v5965_v20 = vld [vmem:[#allocation8 + $0x408] ss:$16 sps:$4 sm:$0xff]  }
 0x17f   :  { %1279 = vmatprep.subr.bf16.mxu0 %v5892_v21  ;;  %1361 = vmatprep.subr.bf16.mxu1 %v5895_v22  ;;  %v438_v21 = vpack.c.bf16 %v6609_v18, %v6609_v18  ;;  %v5970_v22 = vld [vmem:[#allocation8 + $0x424] ss:$16 sps:$4 sm:$0xff]   ;;  %v6043_v18 = vld [vmem:[#allocation8 + $0x5a8] ss:$16 sps:$4 sm:$0xff]  }
 0x182   :  { %1280 = vmatpush1.bf16.msra.mxu0 %v5890_v23  ;;  %1362 = vmatpush1.bf16.msra.mxu1 %v5893_v24  ;;  %v5973_v23 = vld [vmem:[#allocation8 + $0x42c] ss:$16 sps:$4 sm:$0xff]   ;;  %v5968_v24 = vld [vmem:[#allocation8 + $0x420] ss:$16 sps:$4 sm:$0xff]  }
 0x183   :  { %1281 = vmatprep.subr.bf16.mxu0 %v5898_v25  ;;  %1363 = vmatprep.subr.bf16.mxu1 %v5901_v26  ;;  %v5971_v25 = vld [vmem:[#allocation8 + $0x428] ss:$16 sps:$4 sm:$0xff]   ;;  %v5976_v26 = vld [vmem:[#allocation8 + $0x444] ss:$16 sps:$4 sm:$0xff]  }
 0x186   :  { %1282 = vmatpush1.bf16.msra.mxu0 %v5896_v27  ;;  %1364 = vmatpush1.bf16.msra.mxu1 %v5899_v28  ;;  %v5979_v27 = vld [vmem:[#allocation8 + $0x44c] ss:$16 sps:$4 sm:$0xff]   ;;  %v5974_v28 = vld [vmem:[#allocation8 + $0x440] ss:$16 sps:$4 sm:$0xff]  }
 0x187   :  { %1283 = vmatprep.subr.bf16.mxu0 %v5904_v29  ;;  %1365 = vmatprep.subr.bf16.mxu1 %v5907_v30  ;;  %v5977_v29 = vld [vmem:[#allocation8 + $0x448] ss:$16 sps:$4 sm:$0xff]   ;;  %v5982_v30 = vld [vmem:[#allocation8 + $0x464] ss:$16 sps:$4 sm:$0xff]  }
 0x18a   :  { %1284 = vmatpush1.bf16.msra.mxu0 %v5902_v32  ;;  %1366 = vmatpush1.bf16.msra.mxu1 %v5905_v33  ;;  %v5985_v32 = vld [vmem:[#allocation8 + $0x46c] ss:$16 sps:$4 sm:$0xff]   ;;  %v5980_v33 = vld [vmem:[#allocation8 + $0x460] ss:$16 sps:$4 sm:$0xff]  }
 0x18b   :  { %1285 = vmatprep.subr.bf16.mxu0 %v5910_v34  ;;  %1367 = vmatprep.subr.bf16.mxu1 %v5913_v35  ;;  %v5983_v34 = vld [vmem:[#allocation8 + $0x468] ss:$16 sps:$4 sm:$0xff]   ;;  %v5988_v35 = vld [vmem:[#allocation8 + $0x484] ss:$16 sps:$4 sm:$0xff]  }
 0x18e   :  { %1286 = vmatpush1.bf16.msra.mxu0 %v5908_v36  ;;  %1368 = vmatpush1.bf16.msra.mxu1 %v5911_v37  ;;  %v5991_v36 = vld [vmem:[#allocation8 + $0x48c] ss:$16 sps:$4 sm:$0xff]   ;;  %v5986_v37 = vld [vmem:[#allocation8 + $0x480] ss:$16 sps:$4 sm:$0xff]  }
 0x18f   :  { %1287 = vmatprep.subr.bf16.mxu0 %v5916_v43  ;;  %1369 = vmatprep.subr.bf16.mxu1 %v5919_v44  ;;  %v5989_v43 = vld [vmem:[#allocation8 + $0x488] ss:$16 sps:$4 sm:$0xff]   ;;  %v5994_v44 = vld [vmem:[#allocation8 + $0x4a4] ss:$16 sps:$4 sm:$0xff]  }
 0x192   :  { %1288 = vmatpush1.bf16.msra.mxu0 %v5914_v45  ;;  %1370 = vmatpush1.bf16.msra.mxu1 %v5917_v46  ;;  %v5997_v45 = vld [vmem:[#allocation8 + $0x4ac] ss:$16 sps:$4 sm:$0xff]   ;;  %v5992_v46 = vld [vmem:[#allocation8 + $0x4a0] ss:$16 sps:$4 sm:$0xff]  }
 0x193   :  { %1289 = vmatprep.subr.bf16.mxu0 %v5922_v47  ;;  %1371 = vmatprep.subr.bf16.mxu1 %v5925_v48  ;;  %v5995_v47 = vld [vmem:[#allocation8 + $0x4a8] ss:$16 sps:$4 sm:$0xff]   ;;  %v6000_v48 = vld [vmem:[#allocation8 + $0x4c4] ss:$16 sps:$4 sm:$0xff]  }
 0x196   :  { %1290 = vmatpush1.bf16.msra.mxu0 %v5920_v49  ;;  %1372 = vmatpush1.bf16.msra.mxu1 %v5923_v50  ;;  %v6003_v49 = vld [vmem:[#allocation8 + $0x4cc] ss:$16 sps:$4 sm:$0xff]   ;;  %v5998_v50 = vld [vmem:[#allocation8 + $0x4c0] ss:$16 sps:$4 sm:$0xff]  }
 0x197   :  { %1291 = vmatprep.subr.bf16.mxu0 %v5928_v52  ;;  %1373 = vmatprep.subr.bf16.mxu1 %v5931_v53  ;;  %v6001_v52 = vld [vmem:[#allocation8 + $0x4c8] ss:$16 sps:$4 sm:$0xff]   ;;  %v6006_v53 = vld [vmem:[#allocation8 + $0x4e4] ss:$16 sps:$4 sm:$0xff]  }
 0x19a   :  { %1292 = vmatpush1.bf16.msra.mxu0 %v5926_v54  ;;  %1374 = vmatpush1.bf16.msra.mxu1 %v5929_v55  ;;  %v6009_v54 = vld [vmem:[#allocation8 + $0x4ec] ss:$16 sps:$4 sm:$0xff]   ;;  %v6004_v55 = vld [vmem:[#allocation8 + $0x4e0] ss:$16 sps:$4 sm:$0xff]  }
 0x19b   :  { %1293 = vmatprep.subr.bf16.mxu0 %v5934_v56  ;;  %1375 = vmatprep.subr.bf16.mxu1 %v5937_v59  ;;  %v6007_v56 = vld [vmem:[#allocation8 + $0x4e8] ss:$16 sps:$4 sm:$0xff]   ;;  %v6012_v59 = vld [vmem:[#allocation8 + $0x504] ss:$16 sps:$4 sm:$0xff]  }
 0x19e   :  { %1294 = vmatpush1.bf16.msra.mxu0 %v5932_v63  ;;  %1376 = vmatpush1.bf16.msra.mxu1 %v5935_v0  ;;  %v6010_v63 = vld [vmem:[#allocation8 + $0x500] ss:$16 sps:$4 sm:$0xff]   ;;  %v6013_v0 = vld [vmem:[#allocation8 + $0x508] ss:$16 sps:$4 sm:$0xff]  }
 0x19f   :  { %1295 = vmatprep.subr.bf16.mxu0 %v5940_v1  ;;  %1377 = vmatprep.subr.bf16.mxu1 %v5943_v2  ;;  %v6018_v1 = vld [vmem:[#allocation8 + $0x524] ss:$16 sps:$4 sm:$0xff]   ;;  %v6021_v2 = vld [vmem:[#allocation8 + $0x52c] ss:$16 sps:$4 sm:$0xff]  }
 0x1a2   :  { %1296 = vmatpush1.bf16.msra.mxu0 %v5938_v4  ;;  %1378 = vmatpush1.bf16.msra.mxu1 %v5941_v5  ;;  %v6019_v4 = vld [vmem:[#allocation8 + $0x528] ss:$16 sps:$4 sm:$0xff]   ;;  %v6024_v5 = vld [vmem:[#allocation8 + $0x544] ss:$16 sps:$4 sm:$0xff]  }
 0x1a3   :  { %1297 = vmatprep.subr.bf16.mxu0 %v5946_v6  ;;  %1379 = vmatprep.subr.bf16.mxu1 %v5949_v7  ;;  %v6027_v6 = vld [vmem:[#allocation8 + $0x54c] ss:$16 sps:$4 sm:$0xff]   ;;  %v6022_v7 = vld [vmem:[#allocation8 + $0x540] ss:$16 sps:$4 sm:$0xff]  }
 0x1a6   :  { %1298 = vmatpush1.bf16.msra.mxu0 %v5944_v39  ;;  %1380 = vmatpush1.bf16.msra.mxu1 %v5947_v8  ;;  %v6025_v39 = vld [vmem:[#allocation8 + $0x548] ss:$16 sps:$4 sm:$0xff]   ;;  %v6030_v8 = vld [vmem:[#allocation8 + $0x564] ss:$16 sps:$4 sm:$0xff]  }
 0x1a7   :  { %1299 = vmatprep.subr.bf16.mxu0 %v5952_v9  ;;  %1381 = vmatprep.subr.bf16.mxu1 %v5955_v10  ;;  %v6033_v9 = vld [vmem:[#allocation8 + $0x56c] ss:$16 sps:$4 sm:$0xff]   ;;  %v6028_v10 = vld [vmem:[#allocation8 + $0x560] ss:$16 sps:$4 sm:$0xff]  }
 0x1aa   :  { %1300 = vmatpush1.bf16.msra.mxu0 %v5950_v51  ;;  %1382 = vmatpush1.bf16.msra.mxu1 %v5953_v11  ;;  %v6031_v51 = vld [vmem:[#allocation8 + $0x568] ss:$16 sps:$4 sm:$0xff]   ;;  %v6036_v11 = vld [vmem:[#allocation8 + $0x584] ss:$16 sps:$4 sm:$0xff]  }
 0x1ab   :  { %1301 = vmatprep.subr.bf16.mxu0 %v5958_v12  ;;  %1383 = vmatprep.subr.bf16.mxu1 %v5961_v13  ;;  %v6039_v12 = vld [vmem:[#allocation8 + $0x58c] ss:$16 sps:$4 sm:$0xff]   ;;  %v6034_v13 = vld [vmem:[#allocation8 + $0x580] ss:$16 sps:$4 sm:$0xff]  }
 0x1ae   :  { %1302 = vmatpush1.bf16.msra.mxu0 %v5956_v14  ;;  %1384 = vmatpush1.bf16.msra.mxu1 %v5959_v15  ;;  %v6037_v14 = vld [vmem:[#allocation8 + $0x588] ss:$16 sps:$4 sm:$0xff]   ;;  %v6042_v15 = vld [vmem:[#allocation8 + $0x5a4] ss:$16 sps:$4 sm:$0xff]  }
 0x1af   :  { %2194 = vmatprep.subr.bf16.mxu0 %v5964_v16  ;;  %2276 = vmatprep.subr.bf16.mxu1 %v5967_v17  ;;  %v6045_v16 = vld [vmem:[#allocation8 + $0x5ac] ss:$16 sps:$4 sm:$0xff]   ;;  %v6040_v17 = vld [vmem:[#allocation8 + $0x5a0] ss:$16 sps:$4 sm:$0xff]  }
 0x1b1   :  { %1304 = vmatmul.mubr.bf16.vlgmr.msra.gmra.mrb[8].mxu0 %v438_v21  ;;  %1386 = vmatmul.mubr.bf16.vlgmr.msra.gmra.mrb[8].mxu1 %v438_v21  ;;  %v6046_v21 = vld [vmem:[#allocation8 + $0x5c0] ss:$16 sps:$4 sm:$0xff]  }
 0x1b2   :  { %2195 = vmatpush1.bf16.msra.mxu0 %v5962_v19  ;;  %2277 = vmatpush1.bf16.msra.mxu1 %v5965_v20  ;;  %v6048_v19 = vld [vmem:[#allocation8 + $0x5c4] ss:$16 sps:$4 sm:$0xff]   ;;  %v6051_v20 = vld [vmem:[#allocation8 + $0x5cc] ss:$16 sps:$4 sm:$0xff]  }
 0x1b3   :  { %2196 = vmatprep.subr.bf16.mxu0 %v5970_v22  ;;  %2278 = vmatprep.subr.bf16.mxu1 %v5973_v23  ;;  %v6049_v22 = vld [vmem:[#allocation8 + $0x5c8] ss:$16 sps:$4 sm:$0xff]   ;;  %v6054_v23 = vld [vmem:[#allocation8 + $0x5e4] ss:$16 sps:$4 sm:$0xff]  }
 0x1b6   :  { %2197 = vmatpush1.bf16.msra.mxu0 %v5968_v24  ;;  %2279 = vmatpush1.bf16.msra.mxu1 %v5971_v25  ;;  %v6057_v24 = vld [vmem:[#allocation8 + $0x5ec] ss:$16 sps:$4 sm:$0xff]   ;;  %v6052_v25 = vld [vmem:[#allocation8 + $0x5e0] ss:$16 sps:$4 sm:$0xff]  }
 0x1b7   :  { %2198 = vmatprep.subr.bf16.mxu0 %v5976_v26  ;;  %2280 = vmatprep.subr.bf16.mxu1 %v5979_v27  ;;  %v6055_v26 = vld [vmem:[#allocation8 + $0x5e8] ss:$16 sps:$4 sm:$0xff]   ;;  %v6060_v27 = vld [vmem:[#allocation8 + $0x604] ss:$16 sps:$4 sm:$0xff]  }
 0x1ba   :  { %2199 = vmatpush1.bf16.msra.mxu0 %v5974_v28  ;;  %2281 = vmatpush1.bf16.msra.mxu1 %v5977_v29  ;;  %v6063_v28 = vld [vmem:[#allocation8 + $0x60c] ss:$16 sps:$4 sm:$0xff]   ;;  %v7051_v29 = vld [vmem:[#allocation10] ss:$2 sm:$0xf] }
 0x1bb   :  { %2200 = vmatprep.subr.bf16.mxu0 %v5982_v30  ;;  %2282 = vmatprep.subr.bf16.mxu1 %v5985_v32  ;;  %v573_v30 = vrot.slane %v7051_v29, %v7021_v40  ;;  %v577_v32 = vrot.slane %v7051_v29, %v7024_v41 }
 0x1be   :  { %2201 = vmatpush1.bf16.msra.mxu0 %v5980_v33  ;;  %2283 = vmatpush1.bf16.msra.mxu1 %v5983_v34  ;;  %v585_v33 = vrot.slane %v7051_v29, %v7027_v42 }
 0x1bf   :  { %2202 = vmatprep.subr.bf16.mxu0 %v5988_v35  ;;  %2284 = vmatprep.subr.bf16.mxu1 %v5991_v36 }
 0x1c2   :  { %2203 = vmatpush1.bf16.msra.mxu0 %v5986_v37  ;;  %2285 = vmatpush1.bf16.msra.mxu1 %v5989_v43 }
 0x1c3   :  { %2204 = vmatprep.subr.bf16.mxu0 %v5994_v44  ;;  %2286 = vmatprep.subr.bf16.mxu1 %v5997_v45 }
 0x1c6   :  { %2205 = vmatpush1.bf16.msra.mxu0 %v5992_v46  ;;  %2287 = vmatpush1.bf16.msra.mxu1 %v5995_v47 }
 0x1c7   :  { %2206 = vmatprep.subr.bf16.mxu0 %v6000_v48  ;;  %2288 = vmatprep.subr.bf16.mxu1 %v6003_v49 }
 0x1ca   :  { %2207 = vmatpush1.bf16.msra.mxu0 %v5998_v50  ;;  %2289 = vmatpush1.bf16.msra.mxu1 %v6001_v52 }
 0x1cb   :  { %2208 = vmatprep.subr.bf16.mxu0 %v6006_v53  ;;  %2290 = vmatprep.subr.bf16.mxu1 %v6009_v54 }
 0x1ce   :  { %2209 = vmatpush1.bf16.msra.mxu0 %v6004_v55  ;;  %2291 = vmatpush1.bf16.msra.mxu1 %v6007_v56  ;;  %v6058_v55 = vld [vmem:[#allocation8 + $0x600] ss:$16 sps:$4 sm:$0xff]   ;;  %v6061_v56 = vld [vmem:[#allocation8 + $0x608] ss:$16 sps:$4 sm:$0xff]  }
 0x1cf   :  { %2210 = vmatprep.subr.bf16.mxu0 %v6012_v59  ;;  %2292 = vmatprep.subr.bf16.mxu1 %v6015_v61  ;;  %v6066_v61 = vld [vmem:[#allocation8 + $0x624] ss:$16 sps:$4 sm:$0xff]  }
 0x1d2   :  { %2211 = vmatpush1.bf16.msra.mxu0 %v6010_v63  ;;  %2293 = vmatpush1.bf16.msra.mxu1 %v6013_v0  ;;  %v6069_v63 = vld [vmem:[#allocation8 + $0x62c] ss:$16 sps:$4 sm:$0xff]  }
 0x1d3   :  { %2212 = vmatprep.subr.bf16.mxu0 %v6018_v1  ;;  %2294 = vmatprep.subr.bf16.mxu1 %v6021_v2  ;;  %v6064_v1 = vld [vmem:[#allocation8 + $0x620] ss:$16 sps:$4 sm:$0xff]   ;;  %v6067_v2 = vld [vmem:[#allocation8 + $0x628] ss:$16 sps:$4 sm:$0xff]  }
 0x1d6   :  { %2213 = vmatpush1.bf16.msra.mxu0 %v6016_v3  ;;  %2295 = vmatpush1.bf16.msra.mxu1 %v6019_v4  ;;  %v6072_v3 = vld [vmem:[#allocation8 + $0x644] ss:$16 sps:$4 sm:$0xff]   ;;  %v6075_v4 = vld [vmem:[#allocation8 + $0x64c] ss:$16 sps:$4 sm:$0xff]  }
 0x1d7   :  { %2214 = vmatprep.subr.bf16.mxu0 %v6024_v5  ;;  %2296 = vmatprep.subr.bf16.mxu1 %v6027_v6  ;;  %v6070_v5 = vld [vmem:[#allocation8 + $0x640] ss:$16 sps:$4 sm:$0xff]   ;;  %v6073_v6 = vld [vmem:[#allocation8 + $0x648] ss:$16 sps:$4 sm:$0xff]  }
 0x1da   :  { %2215 = vmatpush1.bf16.msra.mxu0 %v6022_v7  ;;  %2297 = vmatpush1.bf16.msra.mxu1 %v6025_v39  ;;  %v6078_v7 = vld [vmem:[#allocation8 + $0x664] ss:$16 sps:$4 sm:$0xff]   ;;  %v6081_v39 = vld [vmem:[#allocation8 + $0x66c] ss:$16 sps:$4 sm:$0xff]  }
 0x1db   :  { %2216 = vmatprep.subr.bf16.mxu0 %v6030_v8  ;;  %2298 = vmatprep.subr.bf16.mxu1 %v6033_v9  ;;  %v6076_v8 = vld [vmem:[#allocation8 + $0x660] ss:$16 sps:$4 sm:$0xff]   ;;  %v6079_v9 = vld [vmem:[#allocation8 + $0x668] ss:$16 sps:$4 sm:$0xff]  }
 0x1de   :  { %2217 = vmatpush1.bf16.msra.mxu0 %v6028_v10  ;;  %2299 = vmatpush1.bf16.msra.mxu1 %v6031_v51  ;;  %v6084_v10 = vld [vmem:[#allocation8 + $0x684] ss:$16 sps:$4 sm:$0xff]   ;;  %v6087_v51 = vld [vmem:[#allocation8 + $0x68c] ss:$16 sps:$4 sm:$0xff]  }
 0x1df   :  { %2218 = vmatprep.subr.bf16.mxu0 %v6036_v11  ;;  %2300 = vmatprep.subr.bf16.mxu1 %v6039_v12  ;;  %v6082_v11 = vld [vmem:[#allocation8 + $0x680] ss:$16 sps:$4 sm:$0xff]   ;;  %v6085_v12 = vld [vmem:[#allocation8 + $0x688] ss:$16 sps:$4 sm:$0xff]  }
 0x1e2   :  { %2219 = vmatpush1.bf16.msra.mxu0 %v6034_v13  ;;  %2301 = vmatpush1.bf16.msra.mxu1 %v6037_v14  ;;  %v6090_v13 = vld [vmem:[#allocation8 + $0x6a4] ss:$16 sps:$4 sm:$0xff]   ;;  %v6093_v14 = vld [vmem:[#allocation8 + $0x6ac] ss:$16 sps:$4 sm:$0xff]  }
 0x1e3   :  { %2220 = vmatprep.subr.bf16.mxu0 %v6042_v15  ;;  %2302 = vmatprep.subr.bf16.mxu1 %v6045_v16  ;;  %v6088_v15 = vld [vmem:[#allocation8 + $0x6a0] ss:$16 sps:$4 sm:$0xff]   ;;  %v6091_v16 = vld [vmem:[#allocation8 + $0x6a8] ss:$16 sps:$4 sm:$0xff]  }
 0x1e6   :  { %2221 = vmatpush1.bf16.msra.mxu0 %v6040_v17  ;;  %2303 = vmatpush1.bf16.msra.mxu1 %v6043_v18  ;;  %v6096_v17 = vld [vmem:[#allocation8 + $0x6c4] ss:$16 sps:$4 sm:$0xff]   ;;  %v6099_v18 = vld [vmem:[#allocation8 + $0x6cc] ss:$16 sps:$4 sm:$0xff]  }
 0x1e7   :  { %2222 = vmatprep.subr.bf16.mxu0 %v6048_v19  ;;  %2304 = vmatprep.subr.bf16.mxu1 %v6051_v20  ;;  %v6094_v19 = vld [vmem:[#allocation8 + $0x6c0] ss:$16 sps:$4 sm:$0xff]   ;;  %v6097_v20 = vld [vmem:[#allocation8 + $0x6c8] ss:$16 sps:$4 sm:$0xff]  }
 0x1ea   :  { %2223 = vmatpush1.bf16.msra.mxu0 %v6046_v21  ;;  %2305 = vmatpush1.bf16.msra.mxu1 %v6049_v22  ;;  %v6102_v21 = vld [vmem:[#allocation8 + $0x6e4] ss:$16 sps:$4 sm:$0xff]   ;;  %v6105_v22 = vld [vmem:[#allocation8 + $0x6ec] ss:$16 sps:$4 sm:$0xff]  }
 0x1eb   :  { %2224 = vmatprep.subr.bf16.mxu0 %v6054_v23  ;;  %2306 = vmatprep.subr.bf16.mxu1 %v6057_v24  ;;  %v6100_v23 = vld [vmem:[#allocation8 + $0x6e0] ss:$16 sps:$4 sm:$0xff]   ;;  %v6103_v24 = vld [vmem:[#allocation8 + $0x6e8] ss:$16 sps:$4 sm:$0xff]  }
 0x1ee   :  { %2225 = vmatpush1.bf16.msra.mxu0 %v6052_v25  ;;  %2307 = vmatpush1.bf16.msra.mxu1 %v6055_v26  ;;  %v6108_v25 = vld [vmem:[#allocation8 + $0x704] ss:$16 sps:$4 sm:$0xff]   ;;  %v6111_v26 = vld [vmem:[#allocation8 + $0x70c] ss:$16 sps:$4 sm:$0xff]  }
 0x1ef   :  { %2235 = vmatprep.subr.bf16.mxu0 %v6060_v27  ;;  %2317 = vmatprep.subr.bf16.mxu1 %v6063_v28  ;;  %v6106_v27 = vld [vmem:[#allocation8 + $0x700] ss:$16 sps:$4 sm:$0xff]   ;;  %v6109_v28 = vld [vmem:[#allocation8 + $0x708] ss:$16 sps:$4 sm:$0xff]  }
 0x284   :  { %v1305_v34 = vpop.f32.mrb[8].mxu0  ;;  %v7059_v35 = vpop.f32.mrb[8].mxu1 }
 0x285   :  { %v5704_v36 = vadd.f32 %v1305_v34, %v573_v30  ;;  %v1307_v37 = vpop.f32.mrb[9].mxu0  ;;  %v1389_v43 = vpop.f32.mrb[9].mxu1  ;;  %v6114_v30 = vld [vmem:[#allocation8 + $0x724] ss:$16 sps:$4 sm:$0xff]   ;;  %v6115_v34 = vld [vmem:[#allocation8 + $0x728] ss:$16 sps:$4 sm:$0xff]  }
 0x286   :  { %v5705_v44 = vadd.f32 %v1307_v37, %v577_v32  ;;  %v5707_v45 = vadd.f32 %v1389_v43, %v585_v33  ;;  %v1309_v46 = vpop.f32.mrb[10].mxu0  ;;  %v1391_v47 = vpop.f32.mrb[10].mxu1  ;;  %v6117_v32 = vld [vmem:[#allocation8 + $0x72c] ss:$16 sps:$4 sm:$0xff]   ;;  %v6112_v33 = vld [vmem:[#allocation8 + $0x720] ss:$16 sps:$4 sm:$0xff]  }
 0x287   :  { %v1310_v48 = vpop.f32.mrb[11].mxu0  ;;  %v1392_v49 = vpop.f32.mrb[11].mxu1  ;;  %6610 = vtanh.f32 %v5704_v36  ;;  %v6120_v36 = vld [vmem:[#allocation8 + $0x744] ss:$16 sps:$4 sm:$0xff]   ;;  %v6123_v37 = vld [vmem:[#allocation8 + $0x74c] ss:$16 sps:$4 sm:$0xff]   ;;  %v581_v47 = vrot.slane %v7051_v29, %v7046_v31 }
 0x288   :  { %6612 = vtanh.f32 %v5705_v44  ;;  %v6118_v43 = vld [vmem:[#allocation8 + $0x740] ss:$16 sps:$4 sm:$0xff]   ;;  %v6121_v44 = vld [vmem:[#allocation8 + $0x748] ss:$16 sps:$4 sm:$0xff]   ;;  %v6129_v46 = vld [vmem:[#allocation8 + $0x76c] ss:$16 sps:$4 sm:$0xff]  }
 0x289   :  { %6614 = vtanh.f32 %v5707_v45  ;;  %v6126_v45 = vld [vmem:[#allocation8 + $0x764] ss:$16 sps:$4 sm:$0xff]   ;;  %v6124_v48 = vld [vmem:[#allocation8 + $0x760] ss:$16 sps:$4 sm:$0xff]   ;;  %v6127_v49 = vld [vmem:[#allocation8 + $0x768] ss:$16 sps:$4 sm:$0xff]  }
 0x28a   :  { %v6136_v29 = vld [vmem:[#allocation8 + $0x7a0] ss:$16 sps:$4 sm:$0xff]  }
 0x291   :  { %v6611_v50 = vpop.eup %6610 }
 0x292   :  { %v6613_v52 = vpop.eup %6612  ;;  %v1398_v59 = vpack.c.bf16 %v6611_v50, %v6611_v50  ;;  %v6132_v50 = vld [vmem:[#allocation8 + $0x784] ss:$16 sps:$4 sm:$0xff]  }
 0x293   :  { %v6615_v53 = vpop.eup %6614  ;;  %v1399_v54 = vpack.c.bf16 %v6613_v52, %v6613_v52  ;;  %v6135_v52 = vld [vmem:[#allocation8 + $0x78c] ss:$16 sps:$4 sm:$0xff]  }
 0x294   :  { %v1401_v0 = vpack.c.bf16 %v6615_v53, %v6615_v53  ;;  %v5706_v53 = vadd.f32 %v7059_v35, %v581_v47  ;;  %v6142_v35 = vld [vmem:[#allocation8 + $0x7c0] ss:$16 sps:$4 sm:$0xff]   ;;  %v6191_v47 = vld [vmem:[#allocation8 + $0x80c] ss:$16 sps:$4 sm:$0xff]  }
 0x295   :  { %2226 = vmatprep.mubr.bf16.mxu0 %v1399_v54  ;;  %2308 = vmatprep.mubr.bf16.mxu1 %v1399_v54  ;;  %v6130_v54 = vld [vmem:[#allocation8 + $0x780] ss:$16 sps:$4 sm:$0xff]  }
 0x296   :  { %2227 = vmatmul.mubr.bf16.vlgmr.msra.gmra.mrb[12].mxu0 %v1398_v59  ;;  %2309 = vmatmul.mubr.bf16.vlgmr.msra.gmra.mrb[12].mxu1 %v1398_v59  ;;  %v6141_v59 = vld [vmem:[#allocation8 + $0x7ac] ss:$16 sps:$4 sm:$0xff]   ;;  %6616 = vtanh.f32 %v5706_v53 }
 0x297   :  { %2236 = vmatpush1.bf16.msra.mxu0 %v6058_v55  ;;  %2318 = vmatpush1.bf16.msra.mxu1 %v6061_v56  ;;  %v6133_v55 = vld [vmem:[#allocation8 + $0x788] ss:$16 sps:$4 sm:$0xff]   ;;  %v6138_v56 = vld [vmem:[#allocation8 + $0x7a4] ss:$16 sps:$4 sm:$0xff]  }
 0x298   :  { %2267 = vmatprep.mubr.bf16.mxu0 %v1401_v0  ;;  %2349 = vmatprep.mubr.bf16.mxu1 %v1401_v0  ;;  %v6147_v0 = vld [vmem:[#allocation8 + $0x7cc] ss:$16 sps:$4 sm:$0xff]  }
 0x299   :  { %2237 = vmatprep.subr.bf16.mxu0 %v6066_v61  ;;  %2319 = vmatprep.subr.bf16.mxu1 %v6069_v63  ;;  %v6139_v61 = vld [vmem:[#allocation8 + $0x7a8] ss:$16 sps:$4 sm:$0xff]   ;;  %v6144_v63 = vld [vmem:[#allocation8 + $0x7c4] ss:$16 sps:$4 sm:$0xff]  }
 0x29b   :  { %2238 = vmatpush1.bf16.msra.mxu0 %v6064_v1  ;;  %2320 = vmatpush1.bf16.msra.mxu1 %v6067_v2  ;;  %v6145_v1 = vld [vmem:[#allocation8 + $0x7c8] ss:$16 sps:$4 sm:$0xff]   ;;  %v6150_v2 = vld [vmem:[#allocation8 + $0x7e4] ss:$16 sps:$4 sm:$0xff]  }
 0x29c   :  { %2239 = vmatprep.subr.bf16.mxu0 %v6072_v3  ;;  %2321 = vmatprep.subr.bf16.mxu1 %v6075_v4  ;;  %v6153_v3 = vld [vmem:[#allocation8 + $0x7ec] ss:$16 sps:$4 sm:$0xff]   ;;  %v6148_v4 = vld [vmem:[#allocation8 + $0x7e0] ss:$16 sps:$4 sm:$0xff]  }
 0x29f   :  { %2240 = vmatpush1.bf16.msra.mxu0 %v6070_v5  ;;  %2322 = vmatpush1.bf16.msra.mxu1 %v6073_v6  ;;  %v6151_v5 = vld [vmem:[#allocation8 + $0x7e8] ss:$16 sps:$4 sm:$0xff]   ;;  %v6154_v6 = vld [vmem:[#allocation11 + $0x40] sm:$0xff]  }
 0x2a0   :  { %2241 = vmatprep.subr.bf16.mxu0 %v6078_v7  ;;  %2323 = vmatprep.subr.bf16.mxu1 %v6081_v39  ;;  %v6155_v7 = vld [vmem:[#allocation11 + $0xc0] sm:$0xff]   ;;  %v6617_v39 = vpop.eup %6616 }
 0x2a3   :  { %2242 = vmatpush1.bf16.msra.mxu0 %v6076_v8  ;;  %2324 = vmatpush1.bf16.msra.mxu1 %v6079_v9  ;;  %v6156_v8 = vld [vmem:[#allocation11] sm:$0xff]  }
 0x2a4   :  { %2243 = vmatprep.subr.bf16.mxu0 %v6084_v10  ;;  %2325 = vmatprep.subr.bf16.mxu1 %v6087_v51  ;;  %v6157_v9 = vld [vmem:[#allocation11 + $0x80] sm:$0xff]   ;;  %v1400_v10 = vpack.c.bf16 %v6617_v39, %v6617_v39  ;;  %v6158_v51 = vld [vmem:[#allocation11 + $0x48] sm:$0xff]  }
 0x2a7   :  { %2244 = vmatpush1.bf16.msra.mxu0 %v6082_v11  ;;  %2326 = vmatpush1.bf16.msra.mxu1 %v6085_v12  ;;  %v6159_v11 = vld [vmem:[#allocation11 + $0xc8] sm:$0xff]  }
 0x2a8   :  { %2245 = vmatprep.subr.bf16.mxu0 %v6090_v13  ;;  %2327 = vmatprep.subr.bf16.mxu1 %v6093_v14  ;;  %v6160_v12 = vld [vmem:[#allocation11 + $0x8] sm:$0xff]   ;;  %v6162_v14 = vld [vmem:[#allocation11 + $0x50] sm:$0xff]  }
 0x2a9   :  { %v6161_v13 = vld [vmem:[#allocation11 + $0x88] sm:$0xff]  }
 0x2ab   :  { %2246 = vmatpush1.bf16.msra.mxu0 %v6088_v15  ;;  %2328 = vmatpush1.bf16.msra.mxu1 %v6091_v16  ;;  %v6163_v15 = vld [vmem:[#allocation11 + $0xd0] sm:$0xff]  }
 0x2ac   :  { %2247 = vmatprep.subr.bf16.mxu0 %v6096_v17  ;;  %2329 = vmatprep.subr.bf16.mxu1 %v6099_v18  ;;  %v6164_v16 = vld [vmem:[#allocation11 + $0x10] sm:$0xff]   ;;  %v6166_v18 = vld [vmem:[#allocation11 + $0x58] sm:$0xff]  }
 0x2ad   :  { %v6165_v17 = vld [vmem:[#allocation11 + $0x90] sm:$0xff]  }
 0x2af   :  { %2248 = vmatpush1.bf16.msra.mxu0 %v6094_v19  ;;  %2330 = vmatpush1.bf16.msra.mxu1 %v6097_v20  ;;  %v6167_v19 = vld [vmem:[#allocation11 + $0xd8] sm:$0xff]  }
 0x2b0   :  { %2249 = vmatprep.subr.bf16.mxu0 %v6102_v21  ;;  %2331 = vmatprep.subr.bf16.mxu1 %v6105_v22  ;;  %v6168_v20 = vld [vmem:[#allocation11 + $0x18] sm:$0xff]   ;;  %v6170_v22 = vld [vmem:[#allocation11 + $0x60] sm:$0xff]  }
 0x2b1   :  { %v6169_v21 = vld [vmem:[#allocation11 + $0x98] sm:$0xff]  }
 0x2b3   :  { %2250 = vmatpush1.bf16.msra.mxu0 %v6100_v23  ;;  %2332 = vmatpush1.bf16.msra.mxu1 %v6103_v24  ;;  %v6171_v23 = vld [vmem:[#allocation11 + $0xe0] sm:$0xff]  }
 0x2b4   :  { %2251 = vmatprep.subr.bf16.mxu0 %v6108_v25  ;;  %2333 = vmatprep.subr.bf16.mxu1 %v6111_v26  ;;  %v6172_v24 = vld [vmem:[#allocation11 + $0x20] sm:$0xff]   ;;  %v6174_v26 = vld [vmem:[#allocation11 + $0x68] sm:$0xff]  }
 0x2b5   :  { %v6173_v25 = vld [vmem:[#allocation11 + $0xa0] sm:$0xff]  }
 0x2b7   :  { %2252 = vmatpush1.bf16.msra.mxu0 %v6106_v27  ;;  %2334 = vmatpush1.bf16.msra.mxu1 %v6109_v28  ;;  %v6175_v27 = vld [vmem:[#allocation11 + $0xe8] sm:$0xff]  }
 0x2b8   :  { %2253 = vmatprep.subr.bf16.mxu0 %v6114_v30  ;;  %2335 = vmatprep.subr.bf16.mxu1 %v6117_v32  ;;  %v6176_v28 = vld [vmem:[#allocation11 + $0x28] sm:$0xff]   ;;  %v6178_v32 = vld [vmem:[#allocation11 + $0x70] sm:$0xff]  }
 0x2b9   :  { %v6177_v30 = vld [vmem:[#allocation11 + $0xa8] sm:$0xff]  }
 0x2bb   :  { %2254 = vmatpush1.bf16.msra.mxu0 %v6112_v33  ;;  %2336 = vmatpush1.bf16.msra.mxu1 %v6115_v34  ;;  %v6179_v33 = vld [vmem:[#allocation11 + $0xf0] sm:$0xff]  }
 0x2bc   :  { %2255 = vmatprep.subr.bf16.mxu0 %v6120_v36  ;;  %2337 = vmatprep.subr.bf16.mxu1 %v6123_v37  ;;  %v6180_v34 = vld [vmem:[#allocation11 + $0x30] sm:$0xff]   ;;  %v6182_v37 = vld [vmem:[#allocation11 + $0x78] sm:$0xff]  }
 0x2bd   :  { %v6181_v36 = vld [vmem:[#allocation11 + $0xb0] sm:$0xff]  }
 0x2bf   :  { %2256 = vmatpush1.bf16.msra.mxu0 %v6118_v43  ;;  %2338 = vmatpush1.bf16.msra.mxu1 %v6121_v44  ;;  %v6183_v43 = vld [vmem:[#allocation11 + $0xf8] sm:$0xff]  }
 0x2c0   :  { %2257 = vmatprep.subr.bf16.mxu0 %v6126_v45  ;;  %2339 = vmatprep.subr.bf16.mxu1 %v6129_v46  ;;  %v6184_v44 = vld [vmem:[#allocation11 + $0x38] sm:$0xff]   ;;  %v6188_v46 = vld [vmem:[#allocation8 + $0x804] ss:$16 sps:$4 sm:$0xff]  }
 0x2c1   :  { %v6185_v45 = vld [vmem:[#allocation11 + $0xb8] sm:$0xff]  }
 0x2c3   :  { %2258 = vmatpush1.bf16.msra.mxu0 %v6124_v48  ;;  %2340 = vmatpush1.bf16.msra.mxu1 %v6127_v49  ;;  %v162_v48 = vsub.s32 5, %v7016_v38  ;;  %v7065_v49 = vld [vmem:[#allocation7] sm:$0xff] }
 0x2c4   :  { %2259 = vmatprep.subr.bf16.mxu0 %v6132_v50  ;;  %2341 = vmatprep.subr.bf16.mxu1 %v6135_v52  ;;  %v1532_v52 = vld [vmem:[#allocation10 + $0x1] ss:$2 sm:$0xf] }
 0x2c5   :  { %v163_v50 = vrot.slane %v7065_v49, %v162_v48  ;;  %v1537_v53 = vrot.slane %v1532_v52, %v7021_v40  ;;  %v6225_v48 = vld [vmem:[#allocation8 + $0x8c8] ss:$16 sps:$4 sm:$0xff]  }
 0x2c7   :  { %2260 = vmatpush1.bf16.msra.mxu0 %v6130_v54  ;;  %2342 = vmatpush1.bf16.msra.mxu1 %v6133_v55  ;;  %v1545_v54 = vrot.slane %v1532_v52, %v7046_v31  ;;  %v383_v55 = vadd.f32 %v7039_v58, %v163_v50  ;;  %v6230_v50 = vld [vmem:[#allocation8 + $0x8e4] ss:$16 sps:$4 sm:$0xff]  }
 0x2c8   :  { %2261 = vmatprep.subr.bf16.mxu0 %v6138_v56  ;;  %2343 = vmatprep.subr.bf16.mxu1 %v6141_v59  ;;  %v1541_v56 = vrot.slane %v1532_v52, %v7024_v41  ;;  %v1549_v59 = vrot.slane %v1532_v52, %v7027_v42  ;;  %v6233_v52 = vld [vmem:[#allocation8 + $0x8ec] ss:$16 sps:$4 sm:$0xff]  }
 0x2c9   :  { %6618 = vtanh.f32 %v383_v55  ;;  %v6236_v55 = vld [vmem:[#allocation8 + $0x904] ss:$16 sps:$4 sm:$0xff]  }
 0x2cb   :  { %2262 = vmatpush1.bf16.msra.mxu0 %v6136_v29  ;;  %2344 = vmatpush1.bf16.msra.mxu1 %v6139_v61 }
 0x2cc   :  { %2263 = vmatprep.subr.bf16.mxu0 %v6144_v63  ;;  %2345 = vmatprep.subr.bf16.mxu1 %v6147_v0 }
 0x2cf   :  { %2264 = vmatpush1.bf16.msra.mxu0 %v6142_v35  ;;  %2346 = vmatpush1.bf16.msra.mxu1 %v6145_v1 }
 0x2d0   :  { %2265 = vmatprep.subr.bf16.mxu0 %v6150_v2  ;;  %2347 = vmatprep.subr.bf16.mxu1 %v6153_v3 }
 0x2d3   :  { %2266 = vmatpush1.bf16.msra.mxu0 %v6148_v4  ;;  %2348 = vmatpush1.bf16.msra.mxu1 %v6151_v5  ;;  %v6619_v58 = vpop.eup %6618 }
 0x2d4   :  { %5616 = vmatprep.subr.bf16.mxu0 %v6154_v6  ;;  %5638 = vmatprep.subr.bf16.mxu1 %v6155_v7 }
 0x2d6   :  { %2268 = vmatmul.mubr.bf16.vlgmr.msra.gmra.mrb[12].mxu0 %v1400_v10  ;;  %2350 = vmatmul.mubr.bf16.vlgmr.msra.gmra.mrb[12].mxu1 %v1400_v10 }
 0x2d7   :  { %5617 = vmatpush3.bf16.msra.mxu0 %v6156_v8  ;;  %5639 = vmatpush3.bf16.msra.mxu1 %v6157_v9 }
 0x2d8   :  { %5618 = vmatprep.subr.bf16.mxu0 %v6158_v51  ;;  %5640 = vmatprep.subr.bf16.mxu1 %v6159_v11  ;;  %v6186_v11 = vld [vmem:[#allocation8 + $0x800] ss:$16 sps:$4 sm:$0xff]  }
 0x2db   :  { %5619 = vmatpush3.bf16.msra.mxu0 %v6160_v12  ;;  %5641 = vmatpush3.bf16.msra.mxu1 %v6161_v13 }
 0x2dc   :  { %5620 = vmatprep.subr.bf16.mxu0 %v6162_v14  ;;  %5642 = vmatprep.subr.bf16.mxu1 %v6163_v15  ;;  %v6189_v14 = vld [vmem:[#allocation8 + $0x808] ss:$16 sps:$4 sm:$0xff]  }
 0x2df   :  { %5621 = vmatpush3.bf16.msra.mxu0 %v6164_v16  ;;  %5643 = vmatpush3.bf16.msra.mxu1 %v6165_v17  ;;  %v6194_v16 = vld [vmem:[#allocation8 + $0x824] ss:$16 sps:$4 sm:$0xff]   ;;  %v2710_v17 = vpack.c.bf16 %v6619_v58, %v6619_v58  ;;  %v6257_v58 = vld [vmem:[#allocation8 + $0x96c] ss:$16 sps:$4 sm:$0xff]  }
 0x2e0   :  { %5622 = vmatprep.subr.bf16.mxu0 %v6166_v18  ;;  %5644 = vmatprep.subr.bf16.mxu1 %v6167_v19  ;;  %v6197_v18 = vld [vmem:[#allocation8 + $0x82c] ss:$16 sps:$4 sm:$0xff]   ;;  %v6192_v19 = vld [vmem:[#allocation8 + $0x820] ss:$16 sps:$4 sm:$0xff]  }
 0x2e3   :  { %5623 = vmatpush3.bf16.msra.mxu0 %v6168_v20  ;;  %5645 = vmatpush3.bf16.msra.mxu1 %v6169_v21  ;;  %v6195_v20 = vld [vmem:[#allocation8 + $0x828] ss:$16 sps:$4 sm:$0xff]   ;;  %v6200_v21 = vld [vmem:[#allocation8 + $0x844] ss:$16 sps:$4 sm:$0xff]  }
 0x2e4   :  { %5624 = vmatprep.subr.bf16.mxu0 %v6170_v22  ;;  %5646 = vmatprep.subr.bf16.mxu1 %v6171_v23  ;;  %v6203_v22 = vld [vmem:[#allocation8 + $0x84c] ss:$16 sps:$4 sm:$0xff]   ;;  %v6198_v23 = vld [vmem:[#allocation8 + $0x840] ss:$16 sps:$4 sm:$0xff]  }
 0x2e7   :  { %5625 = vmatpush3.bf16.msra.mxu0 %v6172_v24  ;;  %5647 = vmatpush3.bf16.msra.mxu1 %v6173_v25  ;;  %v6201_v24 = vld [vmem:[#allocation8 + $0x848] ss:$16 sps:$4 sm:$0xff]   ;;  %v6206_v25 = vld [vmem:[#allocation8 + $0x864] ss:$16 sps:$4 sm:$0xff]  }
 0x2e8   :  { %5626 = vmatprep.subr.bf16.mxu0 %v6174_v26  ;;  %5648 = vmatprep.subr.bf16.mxu1 %v6175_v27  ;;  %v6209_v26 = vld [vmem:[#allocation8 + $0x86c] ss:$16 sps:$4 sm:$0xff]   ;;  %v6204_v27 = vld [vmem:[#allocation8 + $0x860] ss:$16 sps:$4 sm:$0xff]  }
 0x2eb   :  { %5627 = vmatpush3.bf16.msra.mxu0 %v6176_v28  ;;  %5649 = vmatpush3.bf16.msra.mxu1 %v6177_v30  ;;  %v6207_v28 = vld [vmem:[#allocation8 + $0x868] ss:$16 sps:$4 sm:$0xff]   ;;  %v6212_v30 = vld [vmem:[#allocation8 + $0x884] ss:$16 sps:$4 sm:$0xff]  }
 0x2ec   :  { %5628 = vmatprep.subr.bf16.mxu0 %v6178_v32  ;;  %5650 = vmatprep.subr.bf16.mxu1 %v6179_v33  ;;  %v6215_v32 = vld [vmem:[#allocation8 + $0x88c] ss:$16 sps:$4 sm:$0xff]   ;;  %v6210_v33 = vld [vmem:[#allocation8 + $0x880] ss:$16 sps:$4 sm:$0xff]  }
 0x2ef   :  { %5629 = vmatpush3.bf16.msra.mxu0 %v6180_v34  ;;  %5651 = vmatpush3.bf16.msra.mxu1 %v6181_v36  ;;  %v6213_v34 = vld [vmem:[#allocation8 + $0x888] ss:$16 sps:$4 sm:$0xff]   ;;  %v6218_v36 = vld [vmem:[#allocation8 + $0x8a4] ss:$16 sps:$4 sm:$0xff]  }
 0x2f0   :  { %5630 = vmatprep.subr.bf16.mxu0 %v6182_v37  ;;  %5652 = vmatprep.subr.bf16.mxu1 %v6183_v43  ;;  %v6221_v37 = vld [vmem:[#allocation8 + $0x8ac] ss:$16 sps:$4 sm:$0xff]   ;;  %v6216_v43 = vld [vmem:[#allocation8 + $0x8a0] ss:$16 sps:$4 sm:$0xff]  }
 0x2f3   :  { %5631 = vmatpush3.bf16.msra.mxu0 %v6184_v44  ;;  %5653 = vmatpush3.bf16.msra.mxu1 %v6185_v45  ;;  %v6219_v44 = vld [vmem:[#allocation8 + $0x8a8] ss:$16 sps:$4 sm:$0xff]   ;;  %v6224_v45 = vld [vmem:[#allocation8 + $0x8c4] ss:$16 sps:$4 sm:$0xff]  }
 0x2f4   :  { %3505 = vmatprep.subr.bf16.mxu0 %v6188_v46  ;;  %3587 = vmatprep.subr.bf16.mxu1 %v6191_v47  ;;  %v6227_v46 = vld [vmem:[#allocation8 + $0x8cc] ss:$16 sps:$4 sm:$0xff]   ;;  %v6222_v47 = vld [vmem:[#allocation8 + $0x8c0] ss:$16 sps:$4 sm:$0xff]  }
 0x3a9   :  { %v2269_v29 = vpop.f32.mrb[12].mxu0  ;;  %v2351_v61 = vpop.f32.mrb[12].mxu1 }
 0x3aa   :  { %v5708_v63 = vadd.f32 %v2269_v29, %v1537_v53  ;;  %v5710_v0 = vadd.f32 %v2351_v61, %v1545_v54  ;;  %v2271_v35 = vpop.f32.mrb[13].mxu0  ;;  %v2353_v1 = vpop.f32.mrb[13].mxu1  ;;  %v6228_v53 = vld [vmem:[#allocation8 + $0x8e0] ss:$16 sps:$4 sm:$0xff]   ;;  %v6231_v54 = vld [vmem:[#allocation8 + $0x8e8] ss:$16 sps:$4 sm:$0xff]  }
 0x3ab   :  { %v5709_v2 = vadd.f32 %v2271_v35, %v1541_v56  ;;  %v5711_v3 = vadd.f32 %v2353_v1, %v1549_v59  ;;  %v2273_v4 = vpop.f32.mrb[14].mxu0  ;;  %v2355_v5 = vpop.f32.mrb[14].mxu1  ;;  %v6239_v56 = vld [vmem:[#allocation8 + $0x90c] ss:$16 sps:$4 sm:$0xff]   ;;  %v6234_v59 = vld [vmem:[#allocation8 + $0x900] ss:$16 sps:$4 sm:$0xff]  }
 0x3ac   :  { %6620 = vtanh.f32 %v5708_v63  ;;  %v2274_v6 = vpop.f32.mrb[15].mxu0  ;;  %v2356_v7 = vpop.f32.mrb[15].mxu1  ;;  %v6237_v29 = vld [vmem:[#allocation8 + $0x908] ss:$16 sps:$4 sm:$0xff]   ;;  %v6242_v61 = vld [vmem:[#allocation8 + $0x924] ss:$16 sps:$4 sm:$0xff]  }
 0x3ad   :  { %6622 = vtanh.f32 %v5710_v0  ;;  %v6245_v63 = vld [vmem:[#allocation8 + $0x92c] ss:$16 sps:$4 sm:$0xff]   ;;  %v6240_v0 = vld [vmem:[#allocation8 + $0x920] ss:$16 sps:$4 sm:$0xff]   ;;  %v6243_v35 = vld [vmem:[#allocation8 + $0x928] ss:$16 sps:$4 sm:$0xff]  }
 0x3ae   :  { %6624 = vtanh.f32 %v5709_v2  ;;  %v6248_v1 = vld [vmem:[#allocation8 + $0x944] ss:$16 sps:$4 sm:$0xff]   ;;  %v6251_v2 = vld [vmem:[#allocation8 + $0x94c] ss:$16 sps:$4 sm:$0xff]   ;;  %v6246_v4 = vld [vmem:[#allocation8 + $0x940] ss:$16 sps:$4 sm:$0xff]  }
 0x3af   :  { %6626 = vtanh.f32 %v5711_v3  ;;  %v158_v3 = vsub.s32 4, %v7016_v38  ;;  %v6249_v5 = vld [vmem:[#allocation8 + $0x948] ss:$16 sps:$4 sm:$0xff]   ;;  %v6254_v6 = vld [vmem:[#allocation8 + $0x964] ss:$16 sps:$4 sm:$0xff]   ;;  %v170_v7 = vsub.s32 7, %v7016_v38 }
 0x3b6   :  { %v6621_v39 = vpop.eup %6620 }
 0x3b7   :  { %v6623_v8 = vpop.eup %6622  ;;  %v2362_v12 = vpack.c.bf16 %v6621_v39, %v6621_v39  ;;  %v159_v39 = vrot.slane %v7065_v49, %v158_v3  ;;  %v6323_v3 = vld [vmem:[#allocation8 + $0xacc] ss:$16 sps:$4 sm:$0xff]  }
 0x3b8   :  { %v6625_v9 = vpop.eup %6624  ;;  %v2364_v15 = vpack.c.bf16 %v6623_v8, %v6623_v8  ;;  %v6252_v8 = vld [vmem:[#allocation8 + $0x960] ss:$16 sps:$4 sm:$0xff]  }
 0x3b9   :  { %v6627_v10 = vpop.eup %6626  ;;  %v2363_v51 = vpack.c.bf16 %v6625_v9, %v6625_v9  ;;  %v6255_v9 = vld [vmem:[#allocation8 + $0x968] ss:$16 sps:$4 sm:$0xff]  }
 0x3ba   :  { %v2365_v13 = vpack.c.bf16 %v6627_v10, %v6627_v10  ;;  %v6260_v10 = vld [vmem:[#allocation8 + $0x984] ss:$16 sps:$4 sm:$0xff]  }
 0x3bb   :  { %2659 = vmatprep.mubr.bf16.mxu0 %v2363_v51  ;;  %v171_v51 = vrot.slane %v7065_v49, %v170_v7  ;;  %v6329_v7 = vld [vmem:[#allocation8 + $0xaec] ss:$16 sps:$4 sm:$0xff]  }
 0x3bc   :  { %2699 = vmatprep.mubr.bf16.mxu1 %v2365_v13  ;;  %2660 = vmatmul.mubr.bf16.vlgmr.msra.gmra.mrb[16].mxu0 %v2362_v12  ;;  %v381_v12 = vadd.f32 %v7037_v57, %v159_v39  ;;  %v6258_v13 = vld [vmem:[#allocation8 + $0x980] ss:$16 sps:$4 sm:$0xff]   ;;  %v6275_v57 = vld [vmem:[#allocation8 + $0x9cc] ss:$16 sps:$4 sm:$0xff]   ;;  %v6327_v39 = vld [vmem:[#allocation8 + $0xae8] ss:$16 sps:$4 sm:$0xff]  }
 0x3bd   :  { %2700 = vmatmul.mubr.bf16.vlgmr.msra.gmra.mrb[16].mxu1 %v2364_v15  ;;  %3506 = vmatpush1.bf16.msra.mxu0 %v6186_v11  ;;  %v6263_v11 = vld [vmem:[#allocation8 + $0x98c] ss:$16 sps:$4 sm:$0xff]   ;;  %v6266_v15 = vld [vmem:[#allocation8 + $0x9a4] ss:$16 sps:$4 sm:$0xff]  }
 0x3be   :  { %3588 = vmatpush1.bf16.msra.mxu1 %v6189_v14  ;;  %3537 = vmatprep.mubr.bf16.mxu0 %v2710_v17  ;;  %v6261_v14 = vld [vmem:[#allocation8 + $0x988] ss:$16 sps:$4 sm:$0xff]   ;;  %6628 = vtanh.f32 %v381_v12  ;;  %v6341_v12 = vld [vmem:[#allocation8 + $0xb2c] ss:$16 sps:$4 sm:$0xff]  }
 0x3bf   :  { %3619 = vmatprep.mubr.bf16.mxu1 %v2710_v17  ;;  %3507 = vmatprep.subr.bf16.mxu0 %v6194_v16  ;;  %v424_v16 = vadd.f32 %v7043_v62, %v171_v51  ;;  %v6269_v17 = vld [vmem:[#allocation8 + $0x9ac] ss:$16 sps:$4 sm:$0xff]   ;;  %v6333_v51 = vld [vmem:[#allocation8 + $0xb08] ss:$16 sps:$4 sm:$0xff]  }
 0x3c0   :  { %3589 = vmatprep.subr.bf16.mxu1 %v6197_v18  ;;  %v6264_v18 = vld [vmem:[#allocation8 + $0x9a0] ss:$16 sps:$4 sm:$0xff]   ;;  %v6281_v62 = vld [vmem:[#allocation8 + $0x9ec] ss:$16 sps:$4 sm:$0xff]  }
 0x3c1   :  { %3508 = vmatpush1.bf16.msra.mxu0 %v6192_v19  ;;  %v6267_v19 = vld [vmem:[#allocation8 + $0x9a8] ss:$16 sps:$4 sm:$0xff]   ;;  %6630 = vtanh.f32 %v424_v16  ;;  %v6347_v16 = vld [vmem:[#allocation8 + $0xb4c] ss:$16 sps:$4 sm:$0xff]  }
 0x3c2   :  { %3590 = vmatpush1.bf16.msra.mxu1 %v6195_v20  ;;  %3509 = vmatprep.subr.bf16.mxu0 %v6200_v21  ;;  %v6272_v20 = vld [vmem:[#allocation8 + $0x9c4] ss:$16 sps:$4 sm:$0xff]   ;;  %v6270_v21 = vld [vmem:[#allocation8 + $0x9c0] ss:$16 sps:$4 sm:$0xff]  }
 0x3c3   :  { %3591 = vmatprep.subr.bf16.mxu1 %v6203_v22  ;;  %v6273_v22 = vld [vmem:[#allocation8 + $0x9c8] ss:$16 sps:$4 sm:$0xff]  }
 0x3c5   :  { %3510 = vmatpush1.bf16.msra.mxu0 %v6198_v23  ;;  %v6278_v23 = vld [vmem:[#allocation8 + $0x9e4] ss:$16 sps:$4 sm:$0xff]  }
 0x3c6   :  { %3592 = vmatpush1.bf16.msra.mxu1 %v6201_v24  ;;  %3511 = vmatprep.subr.bf16.mxu0 %v6206_v25  ;;  %v6276_v24 = vld [vmem:[#allocation8 + $0x9e0] ss:$16 sps:$4 sm:$0xff]   ;;  %v6279_v25 = vld [vmem:[#allocation8 + $0x9e8] ss:$16 sps:$4 sm:$0xff]  }
 0x3c7   :  { %3593 = vmatprep.subr.bf16.mxu1 %v6209_v26  ;;  %v6284_v26 = vld [vmem:[#allocation8 + $0xa04] ss:$16 sps:$4 sm:$0xff]  }
 0x3c9   :  { %3512 = vmatpush1.bf16.msra.mxu0 %v6204_v27  ;;  %v6629_v27 = vpop.eup %6628 }
 0x3ca   :  { %3594 = vmatpush1.bf16.msra.mxu1 %v6207_v28  ;;  %3513 = vmatprep.subr.bf16.mxu0 %v6212_v30  ;;  %v6287_v28 = vld [vmem:[#allocation8 + $0xa0c] ss:$16 sps:$4 sm:$0xff]  }
 0x3cb   :  { %3595 = vmatprep.subr.bf16.mxu1 %v6215_v32  ;;  %v6631_v30 = vpop.eup %6630  ;;  %v6282_v32 = vld [vmem:[#allocation8 + $0xa00] ss:$16 sps:$4 sm:$0xff]  }
 0x3cd   :  { %3514 = vmatpush1.bf16.msra.mxu0 %v6210_v33  ;;  %v2709_v33 = vpack.c.bf16 %v6629_v27, %v6629_v27  ;;  %v6362_v27 = vld [vmem:[#allocation8 + $0xba4] ss:$16 sps:$4 sm:$0xff]  }
 0x3ce   :  { %3596 = vmatpush1.bf16.msra.mxu1 %v6213_v34  ;;  %3515 = vmatprep.subr.bf16.mxu0 %v6218_v36  ;;  %v6285_v34 = vld [vmem:[#allocation8 + $0xa08] ss:$16 sps:$4 sm:$0xff]   ;;  %v6290_v36 = vld [vmem:[#allocation8 + $0xa24] ss:$16 sps:$4 sm:$0xff]  }
 0x3cf   :  { %3597 = vmatprep.subr.bf16.mxu1 %v6221_v37  ;;  %v2712_v37 = vpack.c.bf16 %v6631_v30, %v6631_v30  ;;  %v6363_v30 = vld [vmem:[#allocation8 + $0xba8] ss:$16 sps:$4 sm:$0xff]  }
 0x3d1   :  { %3516 = vmatpush1.bf16.msra.mxu0 %v6216_v43  ;;  %v6293_v43 = vld [vmem:[#allocation8 + $0xa2c] ss:$16 sps:$4 sm:$0xff]  }
 0x3d2   :  { %3598 = vmatpush1.bf16.msra.mxu1 %v6219_v44  ;;  %3517 = vmatprep.subr.bf16.mxu0 %v6224_v45  ;;  %v6288_v44 = vld [vmem:[#allocation8 + $0xa20] ss:$16 sps:$4 sm:$0xff]   ;;  %v6291_v45 = vld [vmem:[#allocation8 + $0xa28] ss:$16 sps:$4 sm:$0xff]  }
 0x3d3   :  { %3599 = vmatprep.subr.bf16.mxu1 %v6227_v46  ;;  %v6296_v46 = vld [vmem:[#allocation8 + $0xa44] ss:$16 sps:$4 sm:$0xff]  }
 0x3d5   :  { %3518 = vmatpush1.bf16.msra.mxu0 %v6222_v47  ;;  %v6299_v47 = vld [vmem:[#allocation8 + $0xa4c] ss:$16 sps:$4 sm:$0xff]  }
 0x3d6   :  { %3600 = vmatpush1.bf16.msra.mxu1 %v6225_v48  ;;  %3519 = vmatprep.subr.bf16.mxu0 %v6230_v50  ;;  %v6294_v48 = vld [vmem:[#allocation8 + $0xa40] ss:$16 sps:$4 sm:$0xff]   ;;  %v6297_v50 = vld [vmem:[#allocation8 + $0xa48] ss:$16 sps:$4 sm:$0xff]  }
 0x3d7   :  { %3601 = vmatprep.subr.bf16.mxu1 %v6233_v52  ;;  %v6302_v52 = vld [vmem:[#allocation8 + $0xa64] ss:$16 sps:$4 sm:$0xff]  }
 0x3d9   :  { %3520 = vmatpush1.bf16.msra.mxu0 %v6228_v53  ;;  %v6305_v53 = vld [vmem:[#allocation8 + $0xa6c] ss:$16 sps:$4 sm:$0xff]  }
 0x3da   :  { %3602 = vmatpush1.bf16.msra.mxu1 %v6231_v54  ;;  %3521 = vmatprep.subr.bf16.mxu0 %v6236_v55  ;;  %v6300_v54 = vld [vmem:[#allocation8 + $0xa60] ss:$16 sps:$4 sm:$0xff]   ;;  %v6303_v55 = vld [vmem:[#allocation8 + $0xa68] ss:$16 sps:$4 sm:$0xff]  }
 0x3db   :  { %3603 = vmatprep.subr.bf16.mxu1 %v6239_v56  ;;  %v6308_v56 = vld [vmem:[#allocation8 + $0xa84] ss:$16 sps:$4 sm:$0xff]  }
 0x3dd   :  { %3522 = vmatpush1.bf16.msra.mxu0 %v6234_v59  ;;  %v6311_v59 = vld [vmem:[#allocation8 + $0xa8c] ss:$16 sps:$4 sm:$0xff]  }
 0x3de   :  { %3604 = vmatpush1.bf16.msra.mxu1 %v6237_v29  ;;  %3523 = vmatprep.subr.bf16.mxu0 %v6242_v61  ;;  %v6306_v29 = vld [vmem:[#allocation8 + $0xa80] ss:$16 sps:$4 sm:$0xff]   ;;  %v6309_v61 = vld [vmem:[#allocation8 + $0xa88] ss:$16 sps:$4 sm:$0xff]  }
 0x3df   :  { %3605 = vmatprep.subr.bf16.mxu1 %v6245_v63  ;;  %v6314_v63 = vld [vmem:[#allocation8 + $0xaa4] ss:$16 sps:$4 sm:$0xff]  }
 0x3e1   :  { %3524 = vmatpush1.bf16.msra.mxu0 %v6240_v0  ;;  %v6317_v0 = vld [vmem:[#allocation8 + $0xaac] ss:$16 sps:$4 sm:$0xff]  }
 0x3e2   :  { %3606 = vmatpush1.bf16.msra.mxu1 %v6243_v35  ;;  %3525 = vmatprep.subr.bf16.mxu0 %v6248_v1  ;;  %v6312_v35 = vld [vmem:[#allocation8 + $0xaa0] ss:$16 sps:$4 sm:$0xff]   ;;  %v6315_v1 = vld [vmem:[#allocation8 + $0xaa8] ss:$16 sps:$4 sm:$0xff]  }
 0x3e3   :  { %3607 = vmatprep.subr.bf16.mxu1 %v6251_v2  ;;  %v6320_v2 = vld [vmem:[#allocation8 + $0xac4] ss:$16 sps:$4 sm:$0xff]  }
 0x3e5   :  { %3526 = vmatpush1.bf16.msra.mxu0 %v6246_v4  ;;  %v6318_v4 = vld [vmem:[#allocation8 + $0xac0] ss:$16 sps:$4 sm:$0xff]  }
 0x3e6   :  { %3608 = vmatpush1.bf16.msra.mxu1 %v6249_v5  ;;  %3527 = vmatprep.subr.bf16.mxu0 %v6254_v6  ;;  %v6321_v5 = vld [vmem:[#allocation8 + $0xac8] ss:$16 sps:$4 sm:$0xff]   ;;  %v6326_v6 = vld [vmem:[#allocation8 + $0xae4] ss:$16 sps:$4 sm:$0xff]  }
 0x3e7   :  { %3609 = vmatprep.subr.bf16.mxu1 %v6257_v58  ;;  %v6324_v58 = vld [vmem:[#allocation8 + $0xae0] ss:$16 sps:$4 sm:$0xff]  }
 0x3e9   :  { %3528 = vmatpush1.bf16.msra.mxu0 %v6252_v8  ;;  %v6332_v8 = vld [vmem:[#allocation8 + $0xb04] ss:$16 sps:$4 sm:$0xff]  }
 0x3ea   :  { %3610 = vmatpush1.bf16.msra.mxu1 %v6255_v9  ;;  %3529 = vmatprep.subr.bf16.mxu0 %v6260_v10  ;;  %v6335_v9 = vld [vmem:[#allocation8 + $0xb0c] ss:$16 sps:$4 sm:$0xff]   ;;  %v6330_v10 = vld [vmem:[#allocation8 + $0xb00] ss:$16 sps:$4 sm:$0xff]  }
 0x3eb   :  { %3611 = vmatprep.subr.bf16.mxu1 %v6263_v11  ;;  %v6338_v11 = vld [vmem:[#allocation8 + $0xb24] ss:$16 sps:$4 sm:$0xff]  }
 0x3ed   :  { %3530 = vmatpush1.bf16.msra.mxu0 %v6258_v13  ;;  %v6336_v13 = vld [vmem:[#allocation8 + $0xb20] ss:$16 sps:$4 sm:$0xff]  }
 0x3ee   :  { %3612 = vmatpush1.bf16.msra.mxu1 %v6261_v14  ;;  %3531 = vmatprep.subr.bf16.mxu0 %v6266_v15  ;;  %v6339_v14 = vld [vmem:[#allocation8 + $0xb28] ss:$16 sps:$4 sm:$0xff]   ;;  %v6344_v15 = vld [vmem:[#allocation8 + $0xb44] ss:$16 sps:$4 sm:$0xff]  }
 0x3ef   :  { %3613 = vmatprep.subr.bf16.mxu1 %v6269_v17  ;;  %v166_v17 = vsub.s32 6, %v7016_v38 }
 0x3f1   :  { %3532 = vmatpush1.bf16.msra.mxu0 %v6264_v18  ;;  %v6342_v18 = vld [vmem:[#allocation8 + $0xb40] ss:$16 sps:$4 sm:$0xff]  }
 0x3f2   :  { %3614 = vmatpush1.bf16.msra.mxu1 %v6267_v19  ;;  %3533 = vmatprep.subr.bf16.mxu0 %v6272_v20  ;;  %v6345_v19 = vld [vmem:[#allocation8 + $0xb48] ss:$16 sps:$4 sm:$0xff]   ;;  %v6350_v20 = vld [vmem:[#allocation8 + $0xb64] ss:$16 sps:$4 sm:$0xff]  }
 0x3f3   :  { %3615 = vmatprep.subr.bf16.mxu1 %v6275_v57  ;;  %v6353_v57 = vld [vmem:[#allocation8 + $0xb6c] ss:$16 sps:$4 sm:$0xff]  }
 0x3f5   :  { %3534 = vmatpush1.bf16.msra.mxu0 %v6270_v21  ;;  %v167_v21 = vrot.slane %v7065_v49, %v166_v17  ;;  %v6360_v49 = vld [vmem:[#allocation8 + $0xba0] ss:$16 sps:$4 sm:$0xff]   ;;  %v6431_v17 = vld [vmem:[#allocation8 + $0xd0c] ss:$16 sps:$4 sm:$0xff]  }
 0x3f6   :  { %3616 = vmatpush1.bf16.msra.mxu1 %v6273_v22  ;;  %3535 = vmatprep.subr.bf16.mxu0 %v6278_v23  ;;  %v6348_v22 = vld [vmem:[#allocation8 + $0xb60] ss:$16 sps:$4 sm:$0xff]   ;;  %v6351_v23 = vld [vmem:[#allocation8 + $0xb68] ss:$16 sps:$4 sm:$0xff]  }
 0x3f7   :  { %3617 = vmatprep.subr.bf16.mxu1 %v6281_v62  ;;  %v6356_v62 = vld [vmem:[#allocation8 + $0xb84] ss:$16 sps:$4 sm:$0xff]   ;;  %v422_v38 = vadd.f32 %v7041_v60, %v167_v21  ;;  %v6369_v60 = vld [vmem:[#allocation8 + $0xbc8] ss:$16 sps:$4 sm:$0xff]   ;;  %v6432_v21 = vld [vmem:[#allocation8 + $0xd20] ss:$16 sps:$4 sm:$0xff]  }
 0x3f9   :  { %3536 = vmatpush1.bf16.msra.mxu0 %v6276_v24  ;;  %v6359_v24 = vld [vmem:[#allocation8 + $0xb8c] ss:$16 sps:$4 sm:$0xff]   ;;  %6632 = vtanh.f32 %v422_v38  ;;  %v6441_v38 = vld [vmem:[#allocation8 + $0xd48] ss:$16 sps:$4 sm:$0xff]  }
 0x3fa   :  { %3618 = vmatpush1.bf16.msra.mxu1 %v6279_v25  ;;  %3546 = vmatprep.subr.bf16.mxu0 %v6284_v26  ;;  %v6354_v25 = vld [vmem:[#allocation8 + $0xb80] ss:$16 sps:$4 sm:$0xff]   ;;  %v6357_v26 = vld [vmem:[#allocation8 + $0xb88] ss:$16 sps:$4 sm:$0xff]  }
 0x3fb   :  { %3628 = vmatprep.subr.bf16.mxu1 %v6287_v28  ;;  %v6365_v28 = vld [vmem:[#allocation8 + $0xbac] ss:$16 sps:$4 sm:$0xff]  }
 0x3fc   :  { %3538 = vmatmul.mubr.bf16.vlgmr.msra.gmra.mrb[20].mxu0 %v2709_v33 }
 0x3fd   :  { %3620 = vmatmul.mubr.bf16.vlgmr.msra.gmra.mrb[20].mxu1 %v2709_v33  ;;  %3547 = vmatpush1.bf16.msra.mxu0 %v6282_v32  ;;  %v6368_v32 = vld [vmem:[#allocation8 + $0xbc4] ss:$16 sps:$4 sm:$0xff]   ;;  %v6371_v33 = vld [vmem:[#allocation8 + $0xbcc] ss:$16 sps:$4 sm:$0xff]  }
 0x3fe   :  { %3578 = vmatprep.mubr.bf16.mxu0 %v2712_v37  ;;  %3629 = vmatpush1.bf16.msra.mxu1 %v6285_v34  ;;  %v6366_v34 = vld [vmem:[#allocation8 + $0xbc0] ss:$16 sps:$4 sm:$0xff]  }
 0x3ff   :  { %3660 = vmatprep.mubr.bf16.mxu1 %v2712_v37  ;;  %3548 = vmatprep.subr.bf16.mxu0 %v6290_v36  ;;  %v6374_v36 = vld [vmem:[#allocation8 + $0xbe4] ss:$16 sps:$4 sm:$0xff]   ;;  %v6377_v37 = vld [vmem:[#allocation8 + $0xbec] ss:$16 sps:$4 sm:$0xff]  }
 0x400   :  { %3630 = vmatprep.subr.bf16.mxu1 %v6293_v43  ;;  %v6372_v43 = vld [vmem:[#allocation8 + $0xbe0] ss:$16 sps:$4 sm:$0xff]  }
 0x401   :  { %3549 = vmatpush1.bf16.msra.mxu0 %v6288_v44  ;;  %v6375_v44 = vld [vmem:[#allocation8 + $0xbe8] ss:$16 sps:$4 sm:$0xff]  }
 0x402   :  { %3631 = vmatpush1.bf16.msra.mxu1 %v6291_v45  ;;  %3550 = vmatprep.subr.bf16.mxu0 %v6296_v46  ;;  %v6380_v45 = vld [vmem:[#allocation8 + $0xc04] ss:$16 sps:$4 sm:$0xff]  }
 0x403   :  { %3632 = vmatprep.subr.bf16.mxu1 %v6299_v47  ;;  %v6633_v46 = vpop.eup %6632  ;;  %v6383_v47 = vld [vmem:[#allocation8 + $0xc0c] ss:$16 sps:$4 sm:$0xff]  }
 0x405   :  { %3551 = vmatpush1.bf16.msra.mxu0 %v6294_v48  ;;  %v6378_v48 = vld [vmem:[#allocation8 + $0xc00] ss:$16 sps:$4 sm:$0xff]  }
 0x406   :  { %3633 = vmatpush1.bf16.msra.mxu1 %v6297_v50  ;;  %3552 = vmatprep.subr.bf16.mxu0 %v6302_v52  ;;  %v2711_v50 = vpack.c.bf16 %v6633_v46, %v6633_v46  ;;  %v6381_v52 = vld [vmem:[#allocation8 + $0xc08] ss:$16 sps:$4 sm:$0xff]  }
 0x407   :  { %3634 = vmatprep.subr.bf16.mxu1 %v6305_v53  ;;  %v6386_v53 = vld [vmem:[#allocation8 + $0xc24] ss:$16 sps:$4 sm:$0xff]  }
 0x409   :  { %3553 = vmatpush1.bf16.msra.mxu0 %v6300_v54  ;;  %v6389_v54 = vld [vmem:[#allocation8 + $0xc2c] ss:$16 sps:$4 sm:$0xff]  }
 0x40a   :  { %3635 = vmatpush1.bf16.msra.mxu1 %v6303_v55  ;;  %3554 = vmatprep.subr.bf16.mxu0 %v6308_v56  ;;  %v6384_v55 = vld [vmem:[#allocation8 + $0xc20] ss:$16 sps:$4 sm:$0xff]   ;;  %v6387_v56 = vld [vmem:[#allocation8 + $0xc28] ss:$16 sps:$4 sm:$0xff]  }
 0x40b   :  { %3636 = vmatprep.subr.bf16.mxu1 %v6311_v59  ;;  %v6392_v59 = vld [vmem:[#allocation8 + $0xc44] ss:$16 sps:$4 sm:$0xff]  }
 0x40d   :  { %3555 = vmatpush1.bf16.msra.mxu0 %v6306_v29  ;;  %v6395_v29 = vld [vmem:[#allocation8 + $0xc4c] ss:$16 sps:$4 sm:$0xff]  }
 0x40e   :  { %3637 = vmatpush1.bf16.msra.mxu1 %v6309_v61  ;;  %3556 = vmatprep.subr.bf16.mxu0 %v6314_v63  ;;  %v6390_v61 = vld [vmem:[#allocation8 + $0xc40] ss:$16 sps:$4 sm:$0xff]   ;;  %v6393_v63 = vld [vmem:[#allocation8 + $0xc48] ss:$16 sps:$4 sm:$0xff]  }
 0x40f   :  { %3638 = vmatprep.subr.bf16.mxu1 %v6317_v0  ;;  %v6398_v0 = vld [vmem:[#allocation8 + $0xc64] ss:$16 sps:$4 sm:$0xff]  }
 0x411   :  { %3557 = vmatpush1.bf16.msra.mxu0 %v6312_v35  ;;  %v6401_v35 = vld [vmem:[#allocation8 + $0xc6c] ss:$16 sps:$4 sm:$0xff]  }
 0x412   :  { %3639 = vmatpush1.bf16.msra.mxu1 %v6315_v1  ;;  %3558 = vmatprep.subr.bf16.mxu0 %v6320_v2  ;;  %v6396_v1 = vld [vmem:[#allocation8 + $0xc60] ss:$16 sps:$4 sm:$0xff]   ;;  %v6399_v2 = vld [vmem:[#allocation8 + $0xc68] ss:$16 sps:$4 sm:$0xff]  }
 0x413   :  { %3640 = vmatprep.subr.bf16.mxu1 %v6323_v3  ;;  %v6404_v3 = vld [vmem:[#allocation8 + $0xc84] ss:$16 sps:$4 sm:$0xff]  }
 0x415   :  { %3559 = vmatpush1.bf16.msra.mxu0 %v6318_v4  ;;  %v6407_v4 = vld [vmem:[#allocation8 + $0xc8c] ss:$16 sps:$4 sm:$0xff]  }
 0x416   :  { %3641 = vmatpush1.bf16.msra.mxu1 %v6321_v5  ;;  %3560 = vmatprep.subr.bf16.mxu0 %v6326_v6  ;;  %v6402_v5 = vld [vmem:[#allocation8 + $0xc80] ss:$16 sps:$4 sm:$0xff]   ;;  %v6405_v6 = vld [vmem:[#allocation8 + $0xc88] ss:$16 sps:$4 sm:$0xff]  }
 0x417   :  { %3642 = vmatprep.subr.bf16.mxu1 %v6329_v7  ;;  %v6410_v7 = vld [vmem:[#allocation8 + $0xca4] ss:$16 sps:$4 sm:$0xff]  }
 0x419   :  { %3561 = vmatpush1.bf16.msra.mxu0 %v6324_v58  ;;  %v6413_v58 = vld [vmem:[#allocation8 + $0xcac] ss:$16 sps:$4 sm:$0xff]  }
 0x41a   :  { %3643 = vmatpush1.bf16.msra.mxu1 %v6327_v39  ;;  %3562 = vmatprep.subr.bf16.mxu0 %v6332_v8  ;;  %v6408_v39 = vld [vmem:[#allocation8 + $0xca0] ss:$16 sps:$4 sm:$0xff]   ;;  %v6411_v8 = vld [vmem:[#allocation8 + $0xca8] ss:$16 sps:$4 sm:$0xff]  }
 0x41b   :  { %3644 = vmatprep.subr.bf16.mxu1 %v6335_v9  ;;  %v6416_v9 = vld [vmem:[#allocation8 + $0xcc4] ss:$16 sps:$4 sm:$0xff]  }
 0x41d   :  { %3563 = vmatpush1.bf16.msra.mxu0 %v6330_v10  ;;  %v6419_v10 = vld [vmem:[#allocation8 + $0xccc] ss:$16 sps:$4 sm:$0xff]  }
 0x41e   :  { %3645 = vmatpush1.bf16.msra.mxu1 %v6333_v51  ;;  %3564 = vmatprep.subr.bf16.mxu0 %v6338_v11  ;;  %v6414_v51 = vld [vmem:[#allocation8 + $0xcc0] ss:$16 sps:$4 sm:$0xff]   ;;  %v6417_v11 = vld [vmem:[#allocation8 + $0xcc8] ss:$16 sps:$4 sm:$0xff]  }
 0x41f   :  { %3646 = vmatprep.subr.bf16.mxu1 %v6341_v12  ;;  %v6422_v12 = vld [vmem:[#allocation8 + $0xce4] ss:$16 sps:$4 sm:$0xff]  }
 0x421   :  { %3565 = vmatpush1.bf16.msra.mxu0 %v6336_v13  ;;  %v6425_v13 = vld [vmem:[#allocation8 + $0xcec] ss:$16 sps:$4 sm:$0xff]  }
 0x422   :  { %3647 = vmatpush1.bf16.msra.mxu1 %v6339_v14  ;;  %3566 = vmatprep.subr.bf16.mxu0 %v6344_v15  ;;  %v6420_v14 = vld [vmem:[#allocation8 + $0xce0] ss:$16 sps:$4 sm:$0xff]   ;;  %v6423_v15 = vld [vmem:[#allocation8 + $0xce8] ss:$16 sps:$4 sm:$0xff]  }
 0x423   :  { %3648 = vmatprep.subr.bf16.mxu1 %v6347_v16  ;;  %v6428_v16 = vld [vmem:[#allocation8 + $0xd04] ss:$16 sps:$4 sm:$0xff]  }
 0x425   :  { %3567 = vmatpush1.bf16.msra.mxu0 %v6342_v18  ;;  %v6426_v18 = vld [vmem:[#allocation8 + $0xd00] ss:$16 sps:$4 sm:$0xff]  }
 0x426   :  { %3649 = vmatpush1.bf16.msra.mxu1 %v6345_v19  ;;  %3568 = vmatprep.subr.bf16.mxu0 %v6350_v20  ;;  %v6429_v19 = vld [vmem:[#allocation8 + $0xd08] ss:$16 sps:$4 sm:$0xff]   ;;  %v6434_v20 = vld [vmem:[#allocation8 + $0xd24] ss:$16 sps:$4 sm:$0xff]  }
 0x427   :  { %3650 = vmatprep.subr.bf16.mxu1 %v6353_v57  ;;  %v6437_v57 = vld [vmem:[#allocation8 + $0xd2c] ss:$16 sps:$4 sm:$0xff]  }
 0x429   :  { %3569 = vmatpush1.bf16.msra.mxu0 %v6348_v22  ;;  %v6435_v22 = vld [vmem:[#allocation8 + $0xd28] ss:$16 sps:$4 sm:$0xff]  }
 0x42a   :  { %3651 = vmatpush1.bf16.msra.mxu1 %v6351_v23  ;;  %3570 = vmatprep.subr.bf16.mxu0 %v6356_v62  ;;  %v6440_v23 = vld [vmem:[#allocation8 + $0xd44] ss:$16 sps:$4 sm:$0xff]   ;;  %v6443_v62 = vld [vmem:[#allocation8 + $0xd4c] ss:$16 sps:$4 sm:$0xff]  }
 0x42b   :  { %3652 = vmatprep.subr.bf16.mxu1 %v6359_v24  ;;  %v6438_v24 = vld [vmem:[#allocation8 + $0xd40] ss:$16 sps:$4 sm:$0xff]  }
 0x42d   :  { %3571 = vmatpush1.bf16.msra.mxu0 %v6354_v25  ;;  %v6446_v25 = vld [vmem:[#allocation8 + $0xd64] ss:$16 sps:$4 sm:$0xff]  }
 0x42e   :  { %3653 = vmatpush1.bf16.msra.mxu1 %v6357_v26  ;;  %3572 = vmatprep.subr.bf16.mxu0 %v6362_v27  ;;  %v6449_v26 = vld [vmem:[#allocation8 + $0xd6c] ss:$16 sps:$4 sm:$0xff]   ;;  %v6444_v27 = vld [vmem:[#allocation8 + $0xd60] ss:$16 sps:$4 sm:$0xff]  }
 0x42f   :  { %3654 = vmatprep.subr.bf16.mxu1 %v6365_v28  ;;  %v6447_v28 = vld [vmem:[#allocation8 + $0xd68] ss:$16 sps:$4 sm:$0xff]  }
 0x431   :  { %3573 = vmatpush1.bf16.msra.mxu0 %v6360_v49 }
 0x432   :  { %3655 = vmatpush1.bf16.msra.mxu1 %v6363_v30  ;;  %3574 = vmatprep.subr.bf16.mxu0 %v6368_v32  ;;  %v5294_v30 = vld [vmem:[#allocation13] ss:$0 sm:$0xff] }
 0x433   :  { %3656 = vmatprep.subr.bf16.mxu1 %v6371_v33 }
 0x435   :  { %3575 = vmatpush1.bf16.msra.mxu0 %v6366_v34  ;;  %v6452_v34 = vld [vmem:[#allocation8 + $0xd84] ss:$16 sps:$4 sm:$0xff]  }
 0x436   :  { %3657 = vmatpush1.bf16.msra.mxu1 %v6369_v60  ;;  %3576 = vmatprep.subr.bf16.mxu0 %v6374_v36  ;;  %v6455_v60 = vld [vmem:[#allocation8 + $0xd8c] ss:$16 sps:$4 sm:$0xff]  }
 0x437   :  { %3658 = vmatprep.subr.bf16.mxu1 %v6377_v37 }
 0x439   :  { %3577 = vmatpush1.bf16.msra.mxu0 %v6372_v43 }
 0x43a   :  { %3659 = vmatpush1.bf16.msra.mxu1 %v6375_v44  ;;  %4469 = vmatprep.subr.bf16.mxu0 %v6380_v45  ;;  %v6450_v44 = vld [vmem:[#allocation8 + $0xd80] ss:$16 sps:$4 sm:$0xff]   ;;  %v6453_v45 = vld [vmem:[#allocation8 + $0xd88] ss:$16 sps:$4 sm:$0xff]  }
 0x43b   :  { %4551 = vmatprep.subr.bf16.mxu1 %v6383_v47 }
 0x43c   :  { %3579 = vmatmul.mubr.bf16.vlgmr.msra.gmra.mrb[20].mxu0 %v2711_v50 }
 0x43d   :  { %3661 = vmatmul.mubr.bf16.vlgmr.msra.gmra.mrb[20].mxu1 %v2711_v50  ;;  %4470 = vmatpush1.bf16.msra.mxu0 %v6378_v48 }
 0x43e   :  { %4552 = vmatpush1.bf16.msra.mxu1 %v6381_v52  ;;  %4471 = vmatprep.subr.bf16.mxu0 %v6386_v53  ;;  %v6458_v53 = vld [vmem:[#allocation8 + $0xda4] ss:$16 sps:$4 sm:$0xff]  }
 0x43f   :  { %4553 = vmatprep.subr.bf16.mxu1 %v6389_v54  ;;  %v6461_v54 = vld [vmem:[#allocation8 + $0xdac] ss:$16 sps:$4 sm:$0xff]  }
 0x441   :  { %4472 = vmatpush1.bf16.msra.mxu0 %v6384_v55 }
 0x442   :  { %4554 = vmatpush1.bf16.msra.mxu1 %v6387_v56  ;;  %4473 = vmatprep.subr.bf16.mxu0 %v6392_v59  ;;  %v6456_v56 = vld [vmem:[#allocation8 + $0xda0] ss:$16 sps:$4 sm:$0xff]   ;;  %v6459_v59 = vld [vmem:[#allocation8 + $0xda8] ss:$16 sps:$4 sm:$0xff]  }
 0x443   :  { %4555 = vmatprep.subr.bf16.mxu1 %v6395_v29  ;;  %v6464_v29 = vld [vmem:[#allocation8 + $0xdc4] ss:$16 sps:$4 sm:$0xff]  }
 0x445   :  { %4474 = vmatpush1.bf16.msra.mxu0 %v6390_v61  ;;  %v6467_v61 = vld [vmem:[#allocation8 + $0xdcc] ss:$16 sps:$4 sm:$0xff]  }
 0x446   :  { %4556 = vmatpush1.bf16.msra.mxu1 %v6393_v63  ;;  %4475 = vmatprep.subr.bf16.mxu0 %v6398_v0  ;;  %v6462_v63 = vld [vmem:[#allocation8 + $0xdc0] ss:$16 sps:$4 sm:$0xff]   ;;  %v6465_v0 = vld [vmem:[#allocation8 + $0xdc8] ss:$16 sps:$4 sm:$0xff]  }
 0x447   :  { %4557 = vmatprep.subr.bf16.mxu1 %v6401_v35  ;;  %v6470_v35 = vld [vmem:[#allocation8 + $0xde4] ss:$16 sps:$4 sm:$0xff]  }
 0x449   :  { %4476 = vmatpush1.bf16.msra.mxu0 %v6396_v1  ;;  %v6473_v1 = vld [vmem:[#allocation8 + $0xdec] ss:$16 sps:$4 sm:$0xff]  }
 0x44a   :  { %4558 = vmatpush1.bf16.msra.mxu1 %v6399_v2  ;;  %4477 = vmatprep.subr.bf16.mxu0 %v6404_v3  ;;  %v6468_v2 = vld [vmem:[#allocation8 + $0xde0] ss:$16 sps:$4 sm:$0xff]   ;;  %v6471_v3 = vld [vmem:[#allocation8 + $0xde8] ss:$16 sps:$4 sm:$0xff]  }
 0x44b   :  { %4559 = vmatprep.subr.bf16.mxu1 %v6407_v4  ;;  %v6476_v4 = vld [vmem:[#allocation8 + $0xe04] ss:$16 sps:$4 sm:$0xff]  }
 0x44d   :  { %4478 = vmatpush1.bf16.msra.mxu0 %v6402_v5  ;;  %v6479_v5 = vld [vmem:[#allocation8 + $0xe0c] ss:$16 sps:$4 sm:$0xff]  }
 0x44e   :  { %4560 = vmatpush1.bf16.msra.mxu1 %v6405_v6  ;;  %4479 = vmatprep.subr.bf16.mxu0 %v6410_v7  ;;  %v7082_v7 = vld [vmem:[#allocation10 + $0x8] ss:$2 sm:$0xf] }
 0x44f   :  { %4561 = vmatprep.subr.bf16.mxu1 %v6413_v58  ;;  %v2848_v58 = vrot.slane %v7082_v7, %v7021_v40 }
 0x451   :  { %4480 = vmatpush1.bf16.msra.mxu0 %v6408_v39  ;;  %v2852_v39 = vrot.slane %v7082_v7, %v7024_v41 }
 0x452   :  { %4562 = vmatpush1.bf16.msra.mxu1 %v6411_v8  ;;  %4481 = vmatprep.subr.bf16.mxu0 %v6416_v9  ;;  %v2860_v8 = vrot.slane %v7082_v7, %v7027_v42 }
 0x453   :  { %4563 = vmatprep.subr.bf16.mxu1 %v6419_v10 }
 0x455   :  { %4482 = vmatpush1.bf16.msra.mxu0 %v6414_v51 }
 0x456   :  { %4564 = vmatpush1.bf16.msra.mxu1 %v6417_v11  ;;  %4483 = vmatprep.subr.bf16.mxu0 %v6422_v12 }
 0x457   :  { %4565 = vmatprep.subr.bf16.mxu1 %v6425_v13 }
 0x459   :  { %4484 = vmatpush1.bf16.msra.mxu0 %v6420_v14 }
 0x45a   :  { %4566 = vmatpush1.bf16.msra.mxu1 %v6423_v15  ;;  %4485 = vmatprep.subr.bf16.mxu0 %v6428_v16 }
 0x45b   :  { %4567 = vmatprep.subr.bf16.mxu1 %v6431_v17 }
 0x45d   :  { %4486 = vmatpush1.bf16.msra.mxu0 %v6426_v18 }
 0x45e   :  { %4568 = vmatpush1.bf16.msra.mxu1 %v6429_v19  ;;  %4487 = vmatprep.subr.bf16.mxu0 %v6434_v20 }
 0x45f   :  { %4569 = vmatprep.subr.bf16.mxu1 %v6437_v57 }
 0x461   :  { %4488 = vmatpush1.bf16.msra.mxu0 %v6432_v21 }
 0x462   :  { %4570 = vmatpush1.bf16.msra.mxu1 %v6435_v22  ;;  %4489 = vmatprep.subr.bf16.mxu0 %v6440_v23  ;;  %v6474_v22 = vld [vmem:[#allocation8 + $0xe00] ss:$16 sps:$4 sm:$0xff]   ;;  %v6477_v23 = vld [vmem:[#allocation8 + $0xe08] ss:$16 sps:$4 sm:$0xff]  }
 0x463   :  { %4571 = vmatprep.subr.bf16.mxu1 %v6443_v62 }
 0x465   :  { %4490 = vmatpush1.bf16.msra.mxu0 %v6438_v24  ;;  %v6482_v24 = vld [vmem:[#allocation8 + $0xe24] ss:$16 sps:$4 sm:$0xff]  }
 0x466   :  { %4572 = vmatpush1.bf16.msra.mxu1 %v6441_v38  ;;  %4491 = vmatprep.subr.bf16.mxu0 %v6446_v25  ;;  %v6485_v38 = vld [vmem:[#allocation8 + $0xe2c] ss:$16 sps:$4 sm:$0xff]  }
 0x467   :  { %4573 = vmatprep.subr.bf16.mxu1 %v6449_v26  ;;  %v6480_v26 = vld [vmem:[#allocation8 + $0xe20] ss:$16 sps:$4 sm:$0xff]  }
 0x469   :  { %4492 = vmatpush1.bf16.msra.mxu0 %v6444_v27  ;;  %v6483_v27 = vld [vmem:[#allocation8 + $0xe28] ss:$16 sps:$4 sm:$0xff]  }
 0x46a   :  { %4574 = vmatpush1.bf16.msra.mxu1 %v6447_v28  ;;  %4493 = vmatprep.subr.bf16.mxu0 %v6452_v34  ;;  %v6488_v28 = vld [vmem:[#allocation8 + $0xe44] ss:$16 sps:$4 sm:$0xff]   ;;  %v6497_v34 = vld [vmem:[#allocation8 + $0xe6c] ss:$16 sps:$4 sm:$0xff]  }
 0x46b   :  { %4575 = vmatprep.subr.bf16.mxu1 %v6455_v60  ;;  %v6492_v60 = vld [vmem:[#allocation8 + $0xe60] ss:$16 sps:$4 sm:$0xff]  }
 0x46d   :  { %4494 = vmatpush1.bf16.msra.mxu0 %v6450_v44  ;;  %v6498_v44 = vld [vmem:[#allocation8 + $0xe80] ss:$16 sps:$4 sm:$0xff]  }
 0x46e   :  { %4576 = vmatpush1.bf16.msra.mxu1 %v6453_v45  ;;  %4495 = vmatprep.subr.bf16.mxu0 %v6458_v53  ;;  %v6501_v45 = vld [vmem:[#allocation8 + $0xe88] ss:$16 sps:$4 sm:$0xff]   ;;  %v6515_v53 = vld [vmem:[#allocation8 + $0xecc] ss:$16 sps:$4 sm:$0xff]  }
 0x46f   :  { %4577 = vmatprep.subr.bf16.mxu1 %v6461_v54  ;;  %v6510_v54 = vld [vmem:[#allocation8 + $0xec0] ss:$16 sps:$4 sm:$0xff]  }
 0x471   :  { %4496 = vmatpush1.bf16.msra.mxu0 %v6456_v56  ;;  %v6518_v56 = vld [vmem:[#allocation8 + $0xee4] ss:$16 sps:$4 sm:$0xff]  }
 0x472   :  { %4578 = vmatpush1.bf16.msra.mxu1 %v6459_v59  ;;  %4497 = vmatprep.subr.bf16.mxu0 %v6464_v29  ;;  %v6521_v59 = vld [vmem:[#allocation8 + $0xeec] ss:$16 sps:$4 sm:$0xff]   ;;  %v6516_v29 = vld [vmem:[#allocation8 + $0xee0] ss:$16 sps:$4 sm:$0xff]  }
 0x473   :  { %4579 = vmatprep.subr.bf16.mxu1 %v6467_v61  ;;  %v6519_v61 = vld [vmem:[#allocation8 + $0xee8] ss:$16 sps:$4 sm:$0xff]  }
 0x475   :  { %4498 = vmatpush1.bf16.msra.mxu0 %v6462_v63  ;;  %v6524_v63 = vld [vmem:[#allocation8 + $0xf04] ss:$16 sps:$4 sm:$0xff]  }
 0x476   :  { %4580 = vmatpush1.bf16.msra.mxu1 %v6465_v0  ;;  %4499 = vmatprep.subr.bf16.mxu0 %v6470_v35  ;;  %v6527_v0 = vld [vmem:[#allocation8 + $0xf0c] ss:$16 sps:$4 sm:$0xff]   ;;  %v6522_v35 = vld [vmem:[#allocation8 + $0xf00] ss:$16 sps:$4 sm:$0xff]  }
 0x477   :  { %4581 = vmatprep.subr.bf16.mxu1 %v6473_v1  ;;  %v6525_v1 = vld [vmem:[#allocation8 + $0xf08] ss:$16 sps:$4 sm:$0xff]  }
 0x479   :  { %4500 = vmatpush1.bf16.msra.mxu0 %v6468_v2  ;;  %v6530_v2 = vld [vmem:[#allocation8 + $0xf24] ss:$16 sps:$4 sm:$0xff]  }
 0x47a   :  { %4582 = vmatpush1.bf16.msra.mxu1 %v6471_v3  ;;  %4510 = vmatprep.subr.bf16.mxu0 %v6476_v4  ;;  %v6533_v3 = vld [vmem:[#allocation8 + $0xf2c] ss:$16 sps:$4 sm:$0xff]   ;;  %v6528_v4 = vld [vmem:[#allocation8 + $0xf20] ss:$16 sps:$4 sm:$0xff]  }
 0x47b   :  { %4592 = vmatprep.subr.bf16.mxu1 %v6479_v5  ;;  %v6531_v5 = vld [vmem:[#allocation8 + $0xf28] ss:$16 sps:$4 sm:$0xff]  }
 0x48f   :  { %v5632_v49 = vpop.f32.mrb[16].mxu0 }
 0x490   :  { %v5654_v32 = vpop.f32.mrb[16].mxu1  ;;  %v5633_v33 = vpop.f32.mrb[17].mxu0 }
 0x491   :  { %v5634_v36 = vadd.f32 %v5633_v33, %v5632_v49  ;;  %v5655_v37 = vpop.f32.mrb[17].mxu1  ;;  %v5635_v43 = vpop.f32.mrb[18].mxu0  ;;  %v6491_v49 = vld [vmem:[#allocation8 + $0xe4c] ss:$16 sps:$4 sm:$0xff]   ;;  %v6494_v33 = vld [vmem:[#allocation8 + $0xe64] ss:$16 sps:$4 sm:$0xff]  }
 0x492   :  { %v5656_v46 = vadd.f32 %v5655_v37, %v5654_v32  ;;  %v5657_v47 = vpop.f32.mrb[18].mxu1  ;;  %v5636_v48 = vpop.f32.mrb[19].mxu0  ;;  %v6489_v32 = vld [vmem:[#allocation8 + $0xe48] ss:$16 sps:$4 sm:$0xff]   ;;  %v6500_v37 = vld [vmem:[#allocation8 + $0xe84] ss:$16 sps:$4 sm:$0xff]  }
 0x493   :  { %v2662_v50 = vadd.f32 %v5634_v36, %v5294_v30  ;;  %v5658_v52 = vpop.f32.mrb[19].mxu1  ;;  %v6486_v30 = vld [vmem:[#allocation8 + $0xe40] ss:$16 sps:$4 sm:$0xff]   ;;  %v6495_v36 = vld [vmem:[#allocation8 + $0xe68] ss:$16 sps:$4 sm:$0xff]  }
 0x494   :  { %v6503_v43 = vld [vmem:[#allocation8 + $0xe8c] ss:$16 sps:$4 sm:$0xff]   ;;  %v6504_v48 = vld [vmem:[#allocation8 + $0xea0] ss:$16 sps:$4 sm:$0xff]   ;;  %v6512_v52 = vld [vmem:[#allocation8 + $0xec4] ss:$16 sps:$4 sm:$0xff]  }
 0x495   :  { %v2702_v55 = vadd.f32 %v5656_v46, %v2662_v50  ;;  %v6506_v46 = vld [vmem:[#allocation8 + $0xea4] ss:$16 sps:$4 sm:$0xff]   ;;  %v6509_v47 = vld [vmem:[#allocation8 + $0xeac] ss:$16 sps:$4 sm:$0xff]   ;;  %v6507_v50 = vld [vmem:[#allocation8 + $0xea8] ss:$16 sps:$4 sm:$0xff]  }
 0x497   :  { %6634 = vtanh.f32 %v2702_v55  ;;  %v6513_v55 = vld [vmem:[#allocation8 + $0xec8] ss:$16 sps:$4 sm:$0xff]  }
 0x4a1   :  { %v6635_v6 = vpop.eup %6634 }
 0x4a2   :  { %2708 = vst [vmem:[#allocation14] sm:$0x3] %v6635_v6  ;;  %v6536_v6 = vld [vmem:[#allocation8 + $0xf44] ss:$16 sps:$4 sm:$0xff]  }
 0x50f   :  { %v3580_v9 = vpop.f32.mrb[20].mxu0 }
 0x510   :  { %v5712_v10 = vadd.f32 %v3580_v9, %v2848_v58  ;;  %v7090_v51 = vpop.f32.mrb[20].mxu1  ;;  %v3582_v11 = vpop.f32.mrb[21].mxu0  ;;  %v6539_v58 = vld [vmem:[#allocation8 + $0xf4c] ss:$16 sps:$4 sm:$0xff]   ;;  %v6542_v9 = vld [vmem:[#allocation8 + $0xf64] ss:$16 sps:$4 sm:$0xff]  }
 0x511   :  { %v5713_v12 = vadd.f32 %v3582_v11, %v2852_v39  ;;  %v3664_v13 = vpop.f32.mrb[21].mxu1  ;;  %v3584_v14 = vpop.f32.mrb[22].mxu0  ;;  %v6534_v39 = vld [vmem:[#allocation8 + $0xf40] ss:$16 sps:$4 sm:$0xff]   ;;  %v2856_v11 = vrot.slane %v7082_v7, %v7046_v31 }
 0x512   :  { %v5715_v15 = vadd.f32 %v3664_v13, %v2860_v8  ;;  %v3666_v16 = vpop.f32.mrb[22].mxu1  ;;  %v3585_v17 = vpop.f32.mrb[23].mxu0  ;;  %6636 = vtanh.f32 %v5712_v10  ;;  %v6537_v8 = vld [vmem:[#allocation8 + $0xf48] ss:$16 sps:$4 sm:$0xff]   ;;  %v6545_v10 = vld [vmem:[#allocation8 + $0xf6c] ss:$16 sps:$4 sm:$0xff]  }
 0x513   :  { %v3667_v18 = vpop.f32.mrb[23].mxu1  ;;  %6638 = vtanh.f32 %v5713_v12  ;;  %v6540_v12 = vld [vmem:[#allocation8 + $0xf60] ss:$16 sps:$4 sm:$0xff]   ;;  %v6543_v13 = vld [vmem:[#allocation8 + $0xf68] ss:$16 sps:$4 sm:$0xff]   ;;  %v5714_v16 = vadd.f32 %v7090_v51, %v2856_v11 }
 0x514   :  { %6640 = vtanh.f32 %v5715_v15  ;;  %v6548_v14 = vld [vmem:[#allocation8 + $0xf84] ss:$16 sps:$4 sm:$0xff]   ;;  %v6551_v15 = vld [vmem:[#allocation8 + $0xf8c] ss:$16 sps:$4 sm:$0xff]   ;;  %v6546_v17 = vld [vmem:[#allocation8 + $0xf80] ss:$16 sps:$4 sm:$0xff]  }
 0x515   :  { %v6549_v18 = vld [vmem:[#allocation8 + $0xf88] ss:$16 sps:$4 sm:$0xff]   ;;  %6642 = vtanh.f32 %v5714_v16  ;;  %v6552_v7 = vld [vmem:[#allocation8 + $0xfa0] ss:$16 sps:$4 sm:$0xff]  }
 0x516   :  { %v6558_v51 = vld [vmem:[#allocation8 + $0xfc0] ss:$16 sps:$4 sm:$0xff]  }
 0x51c   :  { %v6637_v19 = vpop.eup %6636 }
 0x51d   :  { %v6639_v20 = vpop.eup %6638  ;;  %v3673_v62 = vpack.c.bf16 %v6637_v19, %v6637_v19  ;;  %v6554_v19 = vld [vmem:[#allocation8 + $0xfa4] ss:$16 sps:$4 sm:$0xff]  }
 0x51e   :  { %v6641_v57 = vpop.eup %6640  ;;  %v3674_v21 = vpack.c.bf16 %v6639_v20, %v6639_v20  ;;  %v6557_v20 = vld [vmem:[#allocation8 + $0xfac] ss:$16 sps:$4 sm:$0xff]  }
 0x51f   :  { %v3676_v25 = vpack.c.bf16 %v6641_v57, %v6641_v57  ;;  %v6555_v57 = vld [vmem:[#allocation8 + $0xfa8] ss:$16 sps:$4 sm:$0xff]  }
 0x520   :  { %4501 = vmatprep.mubr.bf16.mxu0 %v3674_v21  ;;  %4583 = vmatprep.mubr.bf16.mxu1 %v3674_v21  ;;  %v6560_v21 = vld [vmem:[#allocation8 + $0xfc4] ss:$16 sps:$4 sm:$0xff]  }
 0x521   :  { %4502 = vmatmul.mubr.bf16.vlgmr.msra.gmra.mrb[24].mxu0 %v3673_v62  ;;  %4584 = vmatmul.mubr.bf16.vlgmr.msra.gmra.mrb[24].mxu1 %v3673_v62  ;;  %v6566_v62 = vld [vmem:[#allocation8 + $0xfe4] ss:$16 sps:$4 sm:$0xff]  }
 0x522   :  { %4511 = vmatpush1.bf16.msra.mxu0 %v6474_v22  ;;  %4593 = vmatpush1.bf16.msra.mxu1 %v6477_v23  ;;  %v6563_v22 = vld [vmem:[#allocation8 + $0xfcc] ss:$16 sps:$4 sm:$0xff]   ;;  %v6561_v23 = vld [vmem:[#allocation8 + $0xfc8] ss:$16 sps:$4 sm:$0xff]  }
 0x523   :  { %4542 = vmatprep.mubr.bf16.mxu0 %v3676_v25  ;;  %4624 = vmatprep.mubr.bf16.mxu1 %v3676_v25  ;;  %v6567_v25 = vld [vmem:[#allocation8 + $0xfe8] ss:$16 sps:$4 sm:$0xff]  }
 0x524   :  { %4512 = vmatprep.subr.bf16.mxu0 %v6482_v24  ;;  %4594 = vmatprep.subr.bf16.mxu1 %v6485_v38  ;;  %v6569_v24 = vld [vmem:[#allocation8 + $0xfec] ss:$16 sps:$4 sm:$0xff]   ;;  %v6564_v38 = vld [vmem:[#allocation8 + $0xfe0] ss:$16 sps:$4 sm:$0xff]  }
 0x526   :  { %4513 = vmatpush1.bf16.msra.mxu0 %v6480_v26  ;;  %4595 = vmatpush1.bf16.msra.mxu1 %v6483_v27  ;;  %v6570_v26 = vld [vmem:[#allocation11 + $0x140] sm:$0xff]  }
 0x527   :  { %4514 = vmatprep.subr.bf16.mxu0 %v6488_v28  ;;  %4596 = vmatprep.subr.bf16.mxu1 %v6491_v49  ;;  %v6571_v27 = vld [vmem:[#allocation11 + $0x1c0] sm:$0xff]   ;;  %v6643_v28 = vpop.eup %6642 }
 0x528   :  { %v6572_v49 = vld [vmem:[#allocation11 + $0x100] sm:$0xff]  }
 0x52a   :  { %4515 = vmatpush1.bf16.msra.mxu0 %v6486_v30  ;;  %4597 = vmatpush1.bf16.msra.mxu1 %v6489_v32  ;;  %v6573_v30 = vld [vmem:[#allocation11 + $0x180] sm:$0xff]   ;;  %v3675_v32 = vpack.c.bf16 %v6643_v28, %v6643_v28 }
 0x52b   :  { %4516 = vmatprep.subr.bf16.mxu0 %v6494_v33  ;;  %4598 = vmatprep.subr.bf16.mxu1 %v6497_v34  ;;  %v6574_v33 = vld [vmem:[#allocation11 + $0x148] sm:$0xff]  }
 0x52c   :  { %v6575_v34 = vld [vmem:[#allocation11 + $0x1c8] sm:$0xff]  }
 0x52e   :  { %4517 = vmatpush1.bf16.msra.mxu0 %v6492_v60  ;;  %4599 = vmatpush1.bf16.msra.mxu1 %v6495_v36  ;;  %v6576_v60 = vld [vmem:[#allocation11 + $0x108] sm:$0xff]  }
 0x52f   :  { %4518 = vmatprep.subr.bf16.mxu0 %v6500_v37  ;;  %4600 = vmatprep.subr.bf16.mxu1 %v6503_v43  ;;  %v6577_v36 = vld [vmem:[#allocation11 + $0x188] sm:$0xff]   ;;  %v6578_v37 = vld [vmem:[#allocation11 + $0x150] sm:$0xff]  }
 0x530   :  { %v6579_v43 = vld [vmem:[#allocation11 + $0x1d0] sm:$0xff]  }
 0x532   :  { %4519 = vmatpush1.bf16.msra.mxu0 %v6498_v44  ;;  %4601 = vmatpush1.bf16.msra.mxu1 %v6501_v45  ;;  %v6580_v44 = vld [vmem:[#allocation11 + $0x110] sm:$0xff]  }
 0x533   :  { %4520 = vmatprep.subr.bf16.mxu0 %v6506_v46  ;;  %4602 = vmatprep.subr.bf16.mxu1 %v6509_v47  ;;  %v6581_v45 = vld [vmem:[#allocation11 + $0x190] sm:$0xff]   ;;  %v6582_v46 = vld [vmem:[#allocation11 + $0x158] sm:$0xff]  }
 0x534   :  { %v6583_v47 = vld [vmem:[#allocation11 + $0x1d8] sm:$0xff]  }
 0x536   :  { %4521 = vmatpush1.bf16.msra.mxu0 %v6504_v48  ;;  %4603 = vmatpush1.bf16.msra.mxu1 %v6507_v50  ;;  %v6584_v48 = vld [vmem:[#allocation11 + $0x118] sm:$0xff]  }
 0x537   :  { %4522 = vmatprep.subr.bf16.mxu0 %v6512_v52  ;;  %4604 = vmatprep.subr.bf16.mxu1 %v6515_v53  ;;  %v6585_v50 = vld [vmem:[#allocation11 + $0x198] sm:$0xff]   ;;  %v6586_v52 = vld [vmem:[#allocation11 + $0x160] sm:$0xff]  }
 0x538   :  { %v6587_v53 = vld [vmem:[#allocation11 + $0x1e0] sm:$0xff]  }
 0x53a   :  { %4523 = vmatpush1.bf16.msra.mxu0 %v6510_v54  ;;  %4605 = vmatpush1.bf16.msra.mxu1 %v6513_v55  ;;  %v6588_v54 = vld [vmem:[#allocation11 + $0x120] sm:$0xff]  }
 0x53b   :  { %4524 = vmatprep.subr.bf16.mxu0 %v6518_v56  ;;  %4606 = vmatprep.subr.bf16.mxu1 %v6521_v59  ;;  %v6589_v55 = vld [vmem:[#allocation11 + $0x1a0] sm:$0xff]   ;;  %v6590_v56 = vld [vmem:[#allocation11 + $0x168] sm:$0xff]  }
 0x53c   :  { %v6591_v59 = vld [vmem:[#allocation11 + $0x1e8] sm:$0xff]  }
 0x53e   :  { %4525 = vmatpush1.bf16.msra.mxu0 %v6516_v29  ;;  %4607 = vmatpush1.bf16.msra.mxu1 %v6519_v61  ;;  %v6592_v29 = vld [vmem:[#allocation11 + $0x128] sm:$0xff]  }
 0x53f   :  { %4526 = vmatprep.subr.bf16.mxu0 %v6524_v63  ;;  %4608 = vmatprep.subr.bf16.mxu1 %v6527_v0  ;;  %v6593_v61 = vld [vmem:[#allocation11 + $0x1a8] sm:$0xff]   ;;  %v6594_v63 = vld [vmem:[#allocation11 + $0x170] sm:$0xff]  }
 0x540   :  { %v6595_v0 = vld [vmem:[#allocation11 + $0x1f0] sm:$0xff]  }
 0x542   :  { %4527 = vmatpush1.bf16.msra.mxu0 %v6522_v35  ;;  %4609 = vmatpush1.bf16.msra.mxu1 %v6525_v1  ;;  %v6596_v35 = vld [vmem:[#allocation11 + $0x130] sm:$0xff]  }
 0x543   :  { %4528 = vmatprep.subr.bf16.mxu0 %v6530_v2  ;;  %4610 = vmatprep.subr.bf16.mxu1 %v6533_v3  ;;  %v6597_v1 = vld [vmem:[#allocation11 + $0x1b0] sm:$0xff]   ;;  %v6598_v2 = vld [vmem:[#allocation11 + $0x178] sm:$0xff]  }
 0x544   :  { %v6599_v3 = vld [vmem:[#allocation11 + $0x1f8] sm:$0xff]  }
 0x546   :  { %4529 = vmatpush1.bf16.msra.mxu0 %v6528_v4  ;;  %4611 = vmatpush1.bf16.msra.mxu1 %v6531_v5  ;;  %v6600_v4 = vld [vmem:[#allocation11 + $0x138] sm:$0xff]  }
 0x547   :  { %4530 = vmatprep.subr.bf16.mxu0 %v6536_v6  ;;  %4612 = vmatprep.subr.bf16.mxu1 %v6539_v58  ;;  %v6601_v5 = vld [vmem:[#allocation11 + $0x1b8] sm:$0xff]  }
 0x548   :  { %v3807_v6 = vld [vmem:[#allocation10 + $0x9] ss:$2 sm:$0xf] }
 0x549   :  { %v3812_v58 = vrot.slane %v3807_v6, %v7021_v40 }
 0x54a   :  { %4531 = vmatpush1.bf16.msra.mxu0 %v6534_v39  ;;  %4613 = vmatpush1.bf16.msra.mxu1 %v6537_v8  ;;  %v3820_v39 = vrot.slane %v3807_v6, %v7046_v31  ;;  %v3816_v8 = vrot.slane %v3807_v6, %v7024_v41 }
 0x54b   :  { %4532 = vmatprep.subr.bf16.mxu0 %v6542_v9  ;;  %4614 = vmatprep.subr.bf16.mxu1 %v6545_v10  ;;  %v3824_v9 = vrot.slane %v3807_v6, %v7027_v42 }
 0x54e   :  { %4533 = vmatpush1.bf16.msra.mxu0 %v6540_v12  ;;  %4615 = vmatpush1.bf16.msra.mxu1 %v6543_v13 }
 0x54f   :  { %4534 = vmatprep.subr.bf16.mxu0 %v6548_v14  ;;  %4616 = vmatprep.subr.bf16.mxu1 %v6551_v15 }
 0x552   :  { %4535 = vmatpush1.bf16.msra.mxu0 %v6546_v17  ;;  %4617 = vmatpush1.bf16.msra.mxu1 %v6549_v18 }
 0x553   :  { %4536 = vmatprep.subr.bf16.mxu0 %v6554_v19  ;;  %4618 = vmatprep.subr.bf16.mxu1 %v6557_v20 }
 0x556   :  { %4537 = vmatpush1.bf16.msra.mxu0 %v6552_v7  ;;  %4619 = vmatpush1.bf16.msra.mxu1 %v6555_v57 }
 0x557   :  { %4538 = vmatprep.subr.bf16.mxu0 %v6560_v21  ;;  %4620 = vmatprep.subr.bf16.mxu1 %v6563_v22 }
 0x55a   :  { %4539 = vmatpush1.bf16.msra.mxu0 %v6558_v51  ;;  %4621 = vmatpush1.bf16.msra.mxu1 %v6561_v23 }
 0x55b   :  { %4540 = vmatprep.subr.bf16.mxu0 %v6566_v62  ;;  %4622 = vmatprep.subr.bf16.mxu1 %v6569_v24 }
 0x55e   :  { %4541 = vmatpush1.bf16.msra.mxu0 %v6564_v38  ;;  %4623 = vmatpush1.bf16.msra.mxu1 %v6567_v25 }
 0x55f   :  { %5660 = vmatprep.subr.bf16.mxu0 %v6570_v26  ;;  %5682 = vmatprep.subr.bf16.mxu1 %v6571_v27 }
 0x561   :  { %4543 = vmatmul.mubr.bf16.vlgmr.msra.gmra.mrb[24].mxu0 %v3675_v32  ;;  %4625 = vmatmul.mubr.bf16.vlgmr.msra.gmra.mrb[24].mxu1 %v3675_v32 }
 0x562   :  { %5661 = vmatpush3.bf16.msra.mxu0 %v6572_v49  ;;  %5683 = vmatpush3.bf16.msra.mxu1 %v6573_v30 }
 0x563   :  { %5662 = vmatprep.subr.bf16.mxu0 %v6574_v33  ;;  %5684 = vmatprep.subr.bf16.mxu1 %v6575_v34 }
 0x566   :  { %5663 = vmatpush3.bf16.msra.mxu0 %v6576_v60  ;;  %5685 = vmatpush3.bf16.msra.mxu1 %v6577_v36 }
 0x567   :  { %5664 = vmatprep.subr.bf16.mxu0 %v6578_v37  ;;  %5686 = vmatprep.subr.bf16.mxu1 %v6579_v43 }
 0x56a   :  { %5665 = vmatpush3.bf16.msra.mxu0 %v6580_v44  ;;  %5687 = vmatpush3.bf16.msra.mxu1 %v6581_v45 }
 0x56b   :  { %5666 = vmatprep.subr.bf16.mxu0 %v6582_v46  ;;  %5688 = vmatprep.subr.bf16.mxu1 %v6583_v47 }
 0x56e   :  { %5667 = vmatpush3.bf16.msra.mxu0 %v6584_v48  ;;  %5689 = vmatpush3.bf16.msra.mxu1 %v6585_v50 }
 0x56f   :  { %5668 = vmatprep.subr.bf16.mxu0 %v6586_v52  ;;  %5690 = vmatprep.subr.bf16.mxu1 %v6587_v53 }
 0x572   :  { %5669 = vmatpush3.bf16.msra.mxu0 %v6588_v54  ;;  %5691 = vmatpush3.bf16.msra.mxu1 %v6589_v55 }
 0x573   :  { %5670 = vmatprep.subr.bf16.mxu0 %v6590_v56  ;;  %5692 = vmatprep.subr.bf16.mxu1 %v6591_v59 }
 0x576   :  { %5671 = vmatpush3.bf16.msra.mxu0 %v6592_v29  ;;  %5693 = vmatpush3.bf16.msra.mxu1 %v6593_v61 }
 0x577   :  { %5672 = vmatprep.subr.bf16.mxu0 %v6594_v63  ;;  %5694 = vmatprep.subr.bf16.mxu1 %v6595_v0 }
 0x57a   :  { %5673 = vmatpush3.bf16.msra.mxu0 %v6596_v35  ;;  %5695 = vmatpush3.bf16.msra.mxu1 %v6597_v1 }
 0x57b   :  { %5674 = vmatprep.subr.bf16.mxu0 %v6598_v2  ;;  %5696 = vmatprep.subr.bf16.mxu1 %v6599_v3 }
 0x57e   :  { %5675 = vmatpush3.bf16.msra.mxu0 %v6600_v4  ;;  %5697 = vmatpush3.bf16.msra.mxu1 %v6601_v5 }
 0x634   :  { %v4544_v10 = vpop.f32.mrb[24].mxu0  ;;  %v4626_v11 = vpop.f32.mrb[24].mxu1 }
 0x635   :  { %v5716_v12 = vadd.f32 %v4544_v10, %v3812_v58  ;;  %v5718_v13 = vadd.f32 %v4626_v11, %v3820_v39  ;;  %v4546_v14 = vpop.f32.mrb[25].mxu0  ;;  %v4628_v15 = vpop.f32.mrb[25].mxu1 }
 0x636   :  { %v5717_v16 = vadd.f32 %v4546_v14, %v3816_v8  ;;  %v5719_v17 = vadd.f32 %v4628_v15, %v3824_v9  ;;  %v4548_v18 = vpop.f32.mrb[26].mxu0  ;;  %v4630_v19 = vpop.f32.mrb[26].mxu1 }
 0x637   :  { %6644 = vtanh.f32 %v5716_v12  ;;  %v4549_v20 = vpop.f32.mrb[27].mxu0  ;;  %v4631_v7 = vpop.f32.mrb[27].mxu1 }
 0x638   :  { %6646 = vtanh.f32 %v5718_v13 }
 0x639   :  { %6648 = vtanh.f32 %v5717_v16 }
 0x63a   :  { %6650 = vtanh.f32 %v5719_v17 }
 0x641   :  { %v6645_v40 = vpop.eup %6644 }
 0x642   :  { %v6647_v41 = vpop.eup %6646  ;;  %v4637_v21 = vpack.c.bf16 %v6645_v40, %v6645_v40 }
 0x643   :  { %v6649_v31 = vpop.eup %6648  ;;  %v4639_v51 = vpack.c.bf16 %v6647_v41, %v6647_v41 }
 0x644   :  { %v6651_v42 = vpop.eup %6650  ;;  %v4638_v57 = vpack.c.bf16 %v6649_v31, %v6649_v31 }
 0x645   :  { %v4640_v22 = vpack.c.bf16 %v6651_v42, %v6651_v42 }
 0x646   :  { %4935 = vmatprep.mubr.bf16.mxu0 %v4638_v57 }
 0x647   :  { %4975 = vmatprep.mubr.bf16.mxu1 %v4640_v22  ;;  %4936 = vmatmul.mubr.bf16.vlgmr.msra.gmra.mrb[28].mxu0 %v4637_v21 }
 0x648   :  { %4976 = vmatmul.mubr.bf16.vlgmr.msra.gmra.mrb[28].mxu1 %v4639_v51 }
 0x649   :  { %6820 = shalt.err (!%p6817_p4)
}
 0x64a   :  { %s6821_s23 = scalar_lea.hbm %s7130_s7, 32 }
 0x64b   :  { %p6822_p5 = scmp.ne.s32.totalorder %s7130_s7, %s6821_s23  ;;  %p6825_p6 = scmp.lt.u32.totalorder %s6821_s23, %s7130_s7 }
 0x64d   :  { %p6827_p7 = pnand %p6825_p6, %p6822_p5 }
 0x64f   :  { %6830 = shalt.err (!%p6827_p7)
}
 0x650   :  { %4994 = dma.vmem_to_hbm [thread:$0]  %s4992_s0, 32, %s7130_s7, [#allocation4]   ;;  %v5583_v24 = vld [vmem:[#allocation13 + $0x1] ss:$0 sm:$0xff] }
 0x651   :  { %s6882_s30 = smov [#allocation15]  }
 0x652   :  { %s5001_s2 = sshll.u32 %s6882_s30, 4  ;;  %s5002_s2 = int_to_ptr.vmem [resolvable:$true] %s5001_s2 }
 0x653   :  { %s6831_s7 = scalar_lea.vmem %s5002_s2, 32  ;;  %p6836_p9 = scmp.lt.s32.totalorder %s5002_s2, %s5002_s2 }
 0x654   :  { %p6832_p8 = scmp.ne.s32.totalorder %s5002_s2, %s6831_s7  ;;  %p6837_p10 = scmp.lt.s32.totalorder %s6831_s7, %s6831_s7 }
 0x656   :  { %p6838_p11 = por %p6837_p10, %p6836_p9 }
 0x658   :  { %p6839_p12 = pnand %p6838_p11, %p6832_p8 }
 0x71a   :  { %v5676_v23 = vpop.f32.mrb[28].mxu0 }
 0x71b   :  { %v5698_v62 = vpop.f32.mrb[28].mxu1  ;;  %v5677_v38 = vpop.f32.mrb[29].mxu0 }
 0x71c   :  { %v5678_v25 = vadd.f32 %v5677_v38, %v5676_v23  ;;  %v5699_v26 = vpop.f32.mrb[29].mxu1  ;;  %v5679_v27 = vpop.f32.mrb[30].mxu0 }
 0x71d   :  { %v5700_v28 = vadd.f32 %v5699_v26, %v5698_v62  ;;  %v5701_v49 = vpop.f32.mrb[30].mxu1  ;;  %v5680_v30 = vpop.f32.mrb[31].mxu0 }
 0x71e   :  { %v4938_v32 = vadd.f32 %v5678_v25, %v5583_v24  ;;  %v5702_v33 = vpop.f32.mrb[31].mxu1 }
 0x720   :  { %v4978_v34 = vadd.f32 %v5700_v28, %v4938_v32 }
 0x722   :  { %6652 = vtanh.f32 %v4978_v34 }
 0x72c   :  { %v6653_v60 = vpop.eup %6652 }
 0x72d   :  { %4984 = vst [vmem:[#allocation15] sm:$0x3] %v6653_v60 }
 0x72e   :  { %6842 = shalt.err (!%p6839_p12)
}
 0x72f   :  { %s6843_s10 = scalar_lea.hbm %s7131_s8, 32 }
 0x730   :  { %p6844_p13 = scmp.ne.s32.totalorder %s7131_s8, %s6843_s10  ;;  %p6847_p0 = scmp.lt.u32.totalorder %s6843_s10, %s7131_s8 }
 0x732   :  { %p6849_p1 = pnand %p6847_p0, %p6844_p13 }
 0x734   :  { %6852 = shalt.err (!%p6849_p1)
}
 0x735   :  { %5004 = dma.vmem_to_hbm [thread:$0]  %s5002_s2, 32, %s7131_s8, [#allocation16]  }
 0x736   :  { %6861 = dma.done.wait [#allocation4], 32  }
 0x737   :  { %6862 = vsyncadd [#allocation4], 4294967264 }
 0x738   :  { %6863 = dma.done.wait [#allocation16], 32  }
 0x739   :  { %6864 = vsyncadd [#allocation16], 4294967264 }
 0x73a   :  { %5011 = vsyncpa [#allocation3], 1 }
 0x73b   :  { %5012 = vsyncpa [#allocation6], 1 }
 0x73c   :  { %5013 = vsyncpa [#allocation9], 1 }
 0x73d   :  { %5014 = vsyncpa [#allocation12], 1 }
 0x73e   :  { %5015 = vsyncpa [#allocation4], 1 }
 0x73f   :  { %5016 = vsyncpa [#allocation16], 1 }

</bundles_post_ra>
